<compile_context>
chip_gen: v5e
topology: v5e:2x2
jax: 0.10.0
libtpu: 0.0.40
codegen_flags: <defaults>
</compile_context>

<pallas_src>
import functools

import jax
import jax.numpy as jnp
from jax.experimental import pallas as pl
from jax.experimental.pallas import tpu as pltpu


def _round_up(x, m):
    return (x + m - 1) // m * m


_NEG_BIG = -1e30   # written into padded bias lanes so they never perturb the softmax


def _row_embed_sum(idx_smem, emb_ref, base, seq_len):
    """sum_{l < seq_len} emb[idx[base + l]] as a (1, h_pad) register value.

    Tokens are gathered in chunks of 8 sequence positions into an (8, h_pad) tile
    (full-vreg sublane occupancy); chunk tiles are combined with full-vreg adds and a
    single sublane reduce yields the row sum.  No VMEM scratch is touched.
    """
    CH = 8
    n_full = seq_len // CH

    acc8 = None
    for c in range(n_full):
        tiles = [emb_ref[pl.ds(idx_smem[base + c * CH + j], 1), :] for j in range(CH)]
        tile8 = jnp.concatenate(tiles, axis=0)               # (8, h_pad)
        acc8 = tile8 if acc8 is None else acc8 + tile8

    row = None
    if acc8 is not None:
        row = jnp.sum(acc8, axis=0, keepdims=True)            # (1, h_pad) sublane reduce

    rem = seq_len - n_full * CH
    if rem:
        off = base + n_full * CH
        tiles = [emb_ref[pl.ds(idx_smem[off + j], 1), :] for j in range(rem)]
        rem_sum = tiles[0] if rem == 1 else jnp.sum(
            jnp.concatenate(tiles, axis=0), axis=0, keepdims=True)
        row = rem_sum if row is None else row + rem_sum
    return row


def _nnmodel_kernel(idx_smem, emb_ref, w_ref, b_ref, out_ref, *,
                    seq_len, block_b, compute_dtype):
    i = pl.program_id(0)                       # batch-tile index

    # ---- Embedding gather + sum over the sequence (register-only, no scratch) ----
    # NOTE: static unroll over the rows of this tile; fine for block_b*L up to a few
    # hundred gathers.  A fori_loop + scratch path would be used for much larger tiles.
    rows = []
    for b in range(block_b):
        base = (i * block_b + b) * seq_len     # flat offset into the SMEM index table
        rows.append(_row_embed_sum(idx_smem, emb_ref, base, seq_len))
    x = jnp.concatenate(rows, axis=0)          # (block_b, h_pad) in vregs

    # ---- Linear: embeds @ W^T + bias  (W passed pre-transposed as (H, V)) ----
    # Padded vocab lanes of bias hold -1e30 (and padded W columns are 0), so no
    # in-kernel masking is needed before the softmax statistics.
    hidden = jnp.dot(x.astype(compute_dtype), w_ref[...].astype(compute_dtype),
                     preferred_element_type=jnp.float32) + b_ref[...]

    # ---- log_softmax over the vocab axis (single lane-dense tile) ----
    m = jnp.max(hidden, axis=1, keepdims=True)
    shifted = hidden - m
    lse = jnp.log(jnp.sum(jnp.exp(shifted), axis=1, keepdims=True))
    out_ref[...] = shifted - lse


def nnmodel_forward(indices, emb, w_t, bias, *, block_b=None,
                    compute_dtype=jnp.float32):
    """log_softmax((sum_l Emb[idx[:, l]]) @ W^T + b, axis=-1)."""
    B, L = indices.shape
    V, H = emb.shape
    assert w_t.shape == (H, V) and bias.shape == (V,)

    # Fill the MXU M dimension as much as the batch allows (perf review item).
    if block_b is None:
        block_b = min(_round_up(B, 8), 128)

    v_pad = _round_up(V, 128)       # lane-dense vocab axis
    h_pad = _round_up(H, 128)       # lane-dense hidden axis
    b_pad = _round_up(B, block_b)

    emb_p = jnp.pad(emb, ((0, v_pad - V), (0, h_pad - H)))
    w_p = jnp.pad(w_t, ((0, h_pad - H), (0, v_pad - V)))
    # Bake the vocab-pad mask into the bias: padded lanes get -1e30.
    bias_p = jnp.pad(bias.reshape(1, V).astype(jnp.float32),
                     ((0, 0), (0, v_pad - V)), constant_values=_NEG_BIG)
    # Pad batch rows with token 0 (their outputs are sliced off) and flatten for SMEM.
    idx_p = jnp.pad(indices, ((0, b_pad - B), (0, 0))).reshape(-1).astype(jnp.int32)

    grid = (b_pad // block_b,)

    kernel = functools.partial(_nnmodel_kernel, seq_len=L, block_b=block_b,
                               compute_dtype=compute_dtype)

    cost = pl.CostEstimate(
        flops=2 * b_pad * h_pad * v_pad + b_pad * L * h_pad,
        transcendentals=b_pad * v_pad,
        bytes_accessed=4 * (v_pad * h_pad + h_pad * v_pad + v_pad
                            + b_pad * v_pad) + 4 * b_pad * L,
    )

    out = pl.pallas_call(
        kernel,
        out_shape=jax.ShapeDtypeStruct((b_pad, v_pad), jnp.float32),
        grid_spec=pltpu.PrefetchScalarGridSpec(
            num_scalar_prefetch=1,                                   # indices -> SMEM
            grid=grid,
            in_specs=[
                pl.BlockSpec((v_pad, h_pad), lambda i, idx: (0, 0)),  # embedding table
                pl.BlockSpec((h_pad, v_pad), lambda i, idx: (0, 0)),  # W^T
                pl.BlockSpec((1, v_pad), lambda i, idx: (0, 0)),      # bias (pad-masked)
            ],
            out_specs=pl.BlockSpec((block_b, v_pad), lambda i, idx: (i, 0)),
        ),
        compiler_params=pltpu.CompilerParams(
            dimension_semantics=("parallel",),      # batch tiles -> both TCs on v7x
            vmem_limit_bytes=32 * 1024 * 1024,
        ),
        cost_estimate=cost,
    )(idx_p, emb_p, w_p, bias_p)

    return out[:B, :V]


def init_params(key, in_dim, h_dim, fake_idx):
    k_emb, k_w, k_b = jax.random.split(key, 3)
    # nn.Embedding default init: N(0, 1); padding_idx row zeroed.
    emb = jax.random.normal(k_emb, (in_dim, h_dim), dtype=jnp.float32)
    emb = emb.at[fake_idx].set(0.0)
    # nn.Linear(h_dim, in_dim) default init: U(-1/sqrt(h_dim), 1/sqrt(h_dim))
    bound = 1.0 / jnp.sqrt(jnp.float32(h_dim))
    w = jax.random.uniform(k_w, (in_dim, h_dim), jnp.float32, -bound, bound)
    b = jax.random.uniform(k_b, (in_dim,), jnp.float32, -bound, bound)
    return emb, w.T, b


if __name__ == "__main__":
    in_dim, h_dim, fake_idx = 16, 32, 0     # vocab, hidden, padding idx
    B, L = 16, 8                            # batch, sequence length

    key = jax.random.PRNGKey(0)
    k_params, k_idx = jax.random.split(key)
    emb, w_t, bias = init_params(k_params, in_dim, h_dim, fake_idx)
    indices = jax.random.randint(k_idx, (B, L), 0, in_dim, dtype=jnp.int32)

    out = nnmodel_forward(indices, emb, w_t, bias)
    jax.block_until_ready(out)

    # pure-JAX reference check (matches the PyTorch forward semantics)
    ref_embeds = jnp.take(emb, indices, axis=0).sum(axis=1)          # (B, H)
    ref_hidden = ref_embeds @ w_t + bias                             # (B, V)
    ref = jax.nn.log_softmax(ref_hidden, axis=1)
    assert out.shape == ref.shape
    assert jnp.allclose(out, ref, atol=1e-4, rtol=1e-4), "mismatch vs reference"

    print("KERNEL_OK")
</pallas_src>

<mosaic_0001>
module attributes {stable_mosaic.version = 11 : i64} {
  func.func @_nnmodel_kernel(%arg0: i32, %arg1: memref<128xi32, #tpu.memory_space<smem>>, %arg2: memref<128x128xf32, #tpu.memory_space<vmem>>, %arg3: memref<128x128xf32, #tpu.memory_space<vmem>>, %arg4: memref<1x128xf32, #tpu.memory_space<vmem>>, %arg5: memref<16x128xf32, #tpu.memory_space<vmem>>) attributes {dimension_semantics = [#tpu.dimension_semantics<parallel>], iteration_bounds = array<i64: 1>, scalar_prefetch = 1 : i64, scratch_operands = 0 : i64, tpu.core_type = #tpu.core_type<tc>, window_params = [{pipeline_mode = #tpu.pipeline_mode<synchronous>, transform_indices = @transform_0, window_bounds = array<i64: 128, 128>}, {pipeline_mode = #tpu.pipeline_mode<synchronous>, transform_indices = @transform_1, window_bounds = array<i64: 128, 128>}, {pipeline_mode = #tpu.pipeline_mode<synchronous>, transform_indices = @transform_2, window_bounds = array<i64: 1, 128>}, {transform_indices = @transform_3, window_bounds = array<i64: 16, 128>}]} {
    %c16_i32 = arith.constant 16 : i32
    %0 = arith.muli %arg0, %c16_i32 : i32
    %c0_i32 = arith.constant 0 : i32
    %1 = arith.addi %0, %c0_i32 : i32
    %c8_i32 = arith.constant 8 : i32
    %2 = arith.muli %1, %c8_i32 : i32
    %c0_i32_0 = arith.constant 0 : i32
    %3 = arith.addi %2, %c0_i32_0 : i32
    %c0_i32_1 = arith.constant 0 : i32
    %4 = arith.addi %3, %c0_i32_1 : i32
    %5 = arith.index_cast %4 : i32 to index
    %6 = memref.load %arg1[%5] : memref<128xi32, #tpu.memory_space<smem>>
    %7 = arith.index_cast %6 : i32 to index
    %c0 = arith.constant 0 : index
    %8 = vector.load %arg2[%7, %c0] : memref<128x128xf32, #tpu.memory_space<vmem>>, vector<1x128xf32>
    %c0_i32_2 = arith.constant 0 : i32
    %9 = arith.addi %2, %c0_i32_2 : i32
    %c1_i32 = arith.constant 1 : i32
    %10 = arith.addi %9, %c1_i32 : i32
    %11 = arith.index_cast %10 : i32 to index
    %12 = memref.load %arg1[%11] : memref<128xi32, #tpu.memory_space<smem>>
    %13 = arith.index_cast %12 : i32 to index
    %c0_3 = arith.constant 0 : index
    %14 = vector.load %arg2[%13, %c0_3] : memref<128x128xf32, #tpu.memory_space<vmem>>, vector<1x128xf32>
    %c0_i32_4 = arith.constant 0 : i32
    %15 = arith.addi %2, %c0_i32_4 : i32
    %c2_i32 = arith.constant 2 : i32
    %16 = arith.addi %15, %c2_i32 : i32
    %17 = arith.index_cast %16 : i32 to index
    %18 = memref.load %arg1[%17] : memref<128xi32, #tpu.memory_space<smem>>
    %19 = arith.index_cast %18 : i32 to index
    %c0_5 = arith.constant 0 : index
    %20 = vector.load %arg2[%19, %c0_5] : memref<128x128xf32, #tpu.memory_space<vmem>>, vector<1x128xf32>
    %c0_i32_6 = arith.constant 0 : i32
    %21 = arith.addi %2, %c0_i32_6 : i32
    %c3_i32 = arith.constant 3 : i32
    %22 = arith.addi %21, %c3_i32 : i32
    %23 = arith.index_cast %22 : i32 to index
    %24 = memref.load %arg1[%23] : memref<128xi32, #tpu.memory_space<smem>>
    %25 = arith.index_cast %24 : i32 to index
    %c0_7 = arith.constant 0 : index
    %26 = vector.load %arg2[%25, %c0_7] : memref<128x128xf32, #tpu.memory_space<vmem>>, vector<1x128xf32>
    %c0_i32_8 = arith.constant 0 : i32
    %27 = arith.addi %2, %c0_i32_8 : i32
    %c4_i32 = arith.constant 4 : i32
    %28 = arith.addi %27, %c4_i32 : i32
    %29 = arith.index_cast %28 : i32 to index
    %30 = memref.load %arg1[%29] : memref<128xi32, #tpu.memory_space<smem>>
    %31 = arith.index_cast %30 : i32 to index
    %c0_9 = arith.constant 0 : index
    %32 = vector.load %arg2[%31, %c0_9] : memref<128x128xf32, #tpu.memory_space<vmem>>, vector<1x128xf32>
    %c0_i32_10 = arith.constant 0 : i32
    %33 = arith.addi %2, %c0_i32_10 : i32
    %c5_i32 = arith.constant 5 : i32
    %34 = arith.addi %33, %c5_i32 : i32
    %35 = arith.index_cast %34 : i32 to index
    %36 = memref.load %arg1[%35] : memref<128xi32, #tpu.memory_space<smem>>
    %37 = arith.index_cast %36 : i32 to index
    %c0_11 = arith.constant 0 : index
    %38 = vector.load %arg2[%37, %c0_11] : memref<128x128xf32, #tpu.memory_space<vmem>>, vector<1x128xf32>
    %c0_i32_12 = arith.constant 0 : i32
    %39 = arith.addi %2, %c0_i32_12 : i32
    %c6_i32 = arith.constant 6 : i32
    %40 = arith.addi %39, %c6_i32 : i32
    %41 = arith.index_cast %40 : i32 to index
    %42 = memref.load %arg1[%41] : memref<128xi32, #tpu.memory_space<smem>>
    %43 = arith.index_cast %42 : i32 to index
    %c0_13 = arith.constant 0 : index
    %44 = vector.load %arg2[%43, %c0_13] : memref<128x128xf32, #tpu.memory_space<vmem>>, vector<1x128xf32>
    %c0_i32_14 = arith.constant 0 : i32
    %45 = arith.addi %2, %c0_i32_14 : i32
    %c7_i32 = arith.constant 7 : i32
    %46 = arith.addi %45, %c7_i32 : i32
    %47 = arith.index_cast %46 : i32 to index
    %48 = memref.load %arg1[%47] : memref<128xi32, #tpu.memory_space<smem>>
    %49 = arith.index_cast %48 : i32 to index
    %c0_15 = arith.constant 0 : index
    %50 = vector.load %arg2[%49, %c0_15] : memref<128x128xf32, #tpu.memory_space<vmem>>, vector<1x128xf32>
    %51 = tpu.concatenate %8, %14, %20, %26, %32, %38, %44, %50 in 0 : vector<1x128xf32>, vector<1x128xf32>, vector<1x128xf32>, vector<1x128xf32>, vector<1x128xf32>, vector<1x128xf32>, vector<1x128xf32>, vector<1x128xf32> -> vector<8x128xf32>
    %cst = arith.constant dense<0.000000e+00> : vector<128xf32>
    %52 = vector.multi_reduction <add>, %51, %cst [0] : vector<8x128xf32> to vector<128xf32>
    %53 = vector.shape_cast %52 : vector<128xf32> to vector<1x128xf32>
    %c16_i32_16 = arith.constant 16 : i32
    %54 = arith.muli %arg0, %c16_i32_16 : i32
    %c1_i32_17 = arith.constant 1 : i32
    %55 = arith.addi %54, %c1_i32_17 : i32
    %c8_i32_18 = arith.constant 8 : i32
    %56 = arith.muli %55, %c8_i32_18 : i32
    %c0_i32_19 = arith.constant 0 : i32
    %57 = arith.addi %56, %c0_i32_19 : i32
    %c0_i32_20 = arith.constant 0 : i32
    %58 = arith.addi %57, %c0_i32_20 : i32
    %59 = arith.index_cast %58 : i32 to index
    %60 = memref.load %arg1[%59] : memref<128xi32, #tpu.memory_space<smem>>
    %61 = arith.index_cast %60 : i32 to index
    %c0_21 = arith.constant 0 : index
    %62 = vector.load %arg2[%61, %c0_21] : memref<128x128xf32, #tpu.memory_space<vmem>>, vector<1x128xf32>
    %c0_i32_22 = arith.constant 0 : i32
    %63 = arith.addi %56, %c0_i32_22 : i32
    %c1_i32_23 = arith.constant 1 : i32
    %64 = arith.addi %63, %c1_i32_23 : i32
    %65 = arith.index_cast %64 : i32 to index
    %66 = memref.load %arg1[%65] : memref<128xi32, #tpu.memory_space<smem>>
    %67 = arith.index_cast %66 : i32 to index
    %c0_24 = arith.constant 0 : index
    %68 = vector.load %arg2[%67, %c0_24] : memref<128x128xf32, #tpu.memory_space<vmem>>, vector<1x128xf32>
    %c0_i32_25 = arith.constant 0 : i32
    %69 = arith.addi %56, %c0_i32_25 : i32
    %c2_i32_26 = arith.constant 2 : i32
    %70 = arith.addi %69, %c2_i32_26 : i32
    %71 = arith.index_cast %70 : i32 to index
    %72 = memref.load %arg1[%71] : memref<128xi32, #tpu.memory_space<smem>>
    %73 = arith.index_cast %72 : i32 to index
    %c0_27 = arith.constant 0 : index
    %74 = vector.load %arg2[%73, %c0_27] : memref<128x128xf32, #tpu.memory_space<vmem>>, vector<1x128xf32>
    %c0_i32_28 = arith.constant 0 : i32
    %75 = arith.addi %56, %c0_i32_28 : i32
    %c3_i32_29 = arith.constant 3 : i32
    %76 = arith.addi %75, %c3_i32_29 : i32
    %77 = arith.index_cast %76 : i32 to index
    %78 = memref.load %arg1[%77] : memref<128xi32, #tpu.memory_space<smem>>
    %79 = arith.index_cast %78 : i32 to index
    %c0_30 = arith.constant 0 : index
    %80 = vector.load %arg2[%79, %c0_30] : memref<128x128xf32, #tpu.memory_space<vmem>>, vector<1x128xf32>
    %c0_i32_31 = arith.constant 0 : i32
    %81 = arith.addi %56, %c0_i32_31 : i32
    %c4_i32_32 = arith.constant 4 : i32
    %82 = arith.addi %81, %c4_i32_32 : i32
    %83 = arith.index_cast %82 : i32 to index
    %84 = memref.load %arg1[%83] : memref<128xi32, #tpu.memory_space<smem>>
    %85 = arith.index_cast %84 : i32 to index
    %c0_33 = arith.constant 0 : index
    %86 = vector.load %arg2[%85, %c0_33] : memref<128x128xf32, #tpu.memory_space<vmem>>, vector<1x128xf32>
    %c0_i32_34 = arith.constant 0 : i32
    %87 = arith.addi %56, %c0_i32_34 : i32
    %c5_i32_35 = arith.constant 5 : i32
    %88 = arith.addi %87, %c5_i32_35 : i32
    %89 = arith.index_cast %88 : i32 to index
    %90 = memref.load %arg1[%89] : memref<128xi32, #tpu.memory_space<smem>>
    %91 = arith.index_cast %90 : i32 to index
    %c0_36 = arith.constant 0 : index
    %92 = vector.load %arg2[%91, %c0_36] : memref<128x128xf32, #tpu.memory_space<vmem>>, vector<1x128xf32>
    %c0_i32_37 = arith.constant 0 : i32
    %93 = arith.addi %56, %c0_i32_37 : i32
    %c6_i32_38 = arith.constant 6 : i32
    %94 = arith.addi %93, %c6_i32_38 : i32
    %95 = arith.index_cast %94 : i32 to index
    %96 = memref.load %arg1[%95] : memref<128xi32, #tpu.memory_space<smem>>
    %97 = arith.index_cast %96 : i32 to index
    %c0_39 = arith.constant 0 : index
    %98 = vector.load %arg2[%97, %c0_39] : memref<128x128xf32, #tpu.memory_space<vmem>>, vector<1x128xf32>
    %c0_i32_40 = arith.constant 0 : i32
    %99 = arith.addi %56, %c0_i32_40 : i32
    %c7_i32_41 = arith.constant 7 : i32
    %100 = arith.addi %99, %c7_i32_41 : i32
    %101 = arith.index_cast %100 : i32 to index
    %102 = memref.load %arg1[%101] : memref<128xi32, #tpu.memory_space<smem>>
    %103 = arith.index_cast %102 : i32 to index
    %c0_42 = arith.constant 0 : index
    %104 = vector.load %arg2[%103, %c0_42] : memref<128x128xf32, #tpu.memory_space<vmem>>, vector<1x128xf32>
    %105 = tpu.concatenate %62, %68, %74, %80, %86, %92, %98, %104 in 0 : vector<1x128xf32>, vector<1x128xf32>, vector<1x128xf32>, vector<1x128xf32>, vector<1x128xf32>, vector<1x128xf32>, vector<1x128xf32>, vector<1x128xf32> -> vector<8x128xf32>
    %cst_43 = arith.constant dense<0.000000e+00> : vector<128xf32>
    %106 = vector.multi_reduction <add>, %105, %cst_43 [0] : vector<8x128xf32> to vector<128xf32>
    %107 = vector.shape_cast %106 : vector<128xf32> to vector<1x128xf32>
    %c16_i32_44 = arith.constant 16 : i32
    %108 = arith.muli %arg0, %c16_i32_44 : i32
    %c2_i32_45 = arith.constant 2 : i32
    %109 = arith.addi %108, %c2_i32_45 : i32
    %c8_i32_46 = arith.constant 8 : i32
    %110 = arith.muli %109, %c8_i32_46 : i32
    %c0_i32_47 = arith.constant 0 : i32
    %111 = arith.addi %110, %c0_i32_47 : i32
    %c0_i32_48 = arith.constant 0 : i32
    %112 = arith.addi %111, %c0_i32_48 : i32
    %113 = arith.index_cast %112 : i32 to index
    %114 = memref.load %arg1[%113] : memref<128xi32, #tpu.memory_space<smem>>
    %115 = arith.index_cast %114 : i32 to index
    %c0_49 = arith.constant 0 : index
    %116 = vector.load %arg2[%115, %c0_49] : memref<128x128xf32, #tpu.memory_space<vmem>>, vector<1x128xf32>
    %c0_i32_50 = arith.constant 0 : i32
    %117 = arith.addi %110, %c0_i32_50 : i32
    %c1_i32_51 = arith.constant 1 : i32
    %118 = arith.addi %117, %c1_i32_51 : i32
    %119 = arith.index_cast %118 : i32 to index
    %120 = memref.load %arg1[%119] : memref<128xi32, #tpu.memory_space<smem>>
    %121 = arith.index_cast %120 : i32 to index
    %c0_52 = arith.constant 0 : index
    %122 = vector.load %arg2[%121, %c0_52] : memref<128x128xf32, #tpu.memory_space<vmem>>, vector<1x128xf32>
    %c0_i32_53 = arith.constant 0 : i32
    %123 = arith.addi %110, %c0_i32_53 : i32
    %c2_i32_54 = arith.constant 2 : i32
    %124 = arith.addi %123, %c2_i32_54 : i32
    %125 = arith.index_cast %124 : i32 to index
    %126 = memref.load %arg1[%125] : memref<128xi32, #tpu.memory_space<smem>>
    %127 = arith.index_cast %126 : i32 to index
    %c0_55 = arith.constant 0 : index
    %128 = vector.load %arg2[%127, %c0_55] : memref<128x128xf32, #tpu.memory_space<vmem>>, vector<1x128xf32>
    %c0_i32_56 = arith.constant 0 : i32
    %129 = arith.addi %110, %c0_i32_56 : i32
    %c3_i32_57 = arith.constant 3 : i32
    %130 = arith.addi %129, %c3_i32_57 : i32
    %131 = arith.index_cast %130 : i32 to index
    %132 = memref.load %arg1[%131] : memref<128xi32, #tpu.memory_space<smem>>
    %133 = arith.index_cast %132 : i32 to index
    %c0_58 = arith.constant 0 : index
    %134 = vector.load %arg2[%133, %c0_58] : memref<128x128xf32, #tpu.memory_space<vmem>>, vector<1x128xf32>
    %c0_i32_59 = arith.constant 0 : i32
    %135 = arith.addi %110, %c0_i32_59 : i32
    %c4_i32_60 = arith.constant 4 : i32
    %136 = arith.addi %135, %c4_i32_60 : i32
    %137 = arith.index_cast %136 : i32 to index
    %138 = memref.load %arg1[%137] : memref<128xi32, #tpu.memory_space<smem>>
    %139 = arith.index_cast %138 : i32 to index
    %c0_61 = arith.constant 0 : index
    %140 = vector.load %arg2[%139, %c0_61] : memref<128x128xf32, #tpu.memory_space<vmem>>, vector<1x128xf32>
    %c0_i32_62 = arith.constant 0 : i32
    %141 = arith.addi %110, %c0_i32_62 : i32
    %c5_i32_63 = arith.constant 5 : i32
    %142 = arith.addi %141, %c5_i32_63 : i32
    %143 = arith.index_cast %142 : i32 to index
    %144 = memref.load %arg1[%143] : memref<128xi32, #tpu.memory_space<smem>>
    %145 = arith.index_cast %144 : i32 to index
    %c0_64 = arith.constant 0 : index
    %146 = vector.load %arg2[%145, %c0_64] : memref<128x128xf32, #tpu.memory_space<vmem>>, vector<1x128xf32>
    %c0_i32_65 = arith.constant 0 : i32
    %147 = arith.addi %110, %c0_i32_65 : i32
    %c6_i32_66 = arith.constant 6 : i32
    %148 = arith.addi %147, %c6_i32_66 : i32
    %149 = arith.index_cast %148 : i32 to index
    %150 = memref.load %arg1[%149] : memref<128xi32, #tpu.memory_space<smem>>
    %151 = arith.index_cast %150 : i32 to index
    %c0_67 = arith.constant 0 : index
    %152 = vector.load %arg2[%151, %c0_67] : memref<128x128xf32, #tpu.memory_space<vmem>>, vector<1x128xf32>
    %c0_i32_68 = arith.constant 0 : i32
    %153 = arith.addi %110, %c0_i32_68 : i32
    %c7_i32_69 = arith.constant 7 : i32
    %154 = arith.addi %153, %c7_i32_69 : i32
    %155 = arith.index_cast %154 : i32 to index
    %156 = memref.load %arg1[%155] : memref<128xi32, #tpu.memory_space<smem>>
    %157 = arith.index_cast %156 : i32 to index
    %c0_70 = arith.constant 0 : index
    %158 = vector.load %arg2[%157, %c0_70] : memref<128x128xf32, #tpu.memory_space<vmem>>, vector<1x128xf32>
    %159 = tpu.concatenate %116, %122, %128, %134, %140, %146, %152, %158 in 0 : vector<1x128xf32>, vector<1x128xf32>, vector<1x128xf32>, vector<1x128xf32>, vector<1x128xf32>, vector<1x128xf32>, vector<1x128xf32>, vector<1x128xf32> -> vector<8x128xf32>
    %cst_71 = arith.constant dense<0.000000e+00> : vector<128xf32>
    %160 = vector.multi_reduction <add>, %159, %cst_71 [0] : vector<8x128xf32> to vector<128xf32>
    %161 = vector.shape_cast %160 : vector<128xf32> to vector<1x128xf32>
    %c16_i32_72 = arith.constant 16 : i32
    %162 = arith.muli %arg0, %c16_i32_72 : i32
    %c3_i32_73 = arith.constant 3 : i32
    %163 = arith.addi %162, %c3_i32_73 : i32
    %c8_i32_74 = arith.constant 8 : i32
    %164 = arith.muli %163, %c8_i32_74 : i32
    %c0_i32_75 = arith.constant 0 : i32
    %165 = arith.addi %164, %c0_i32_75 : i32
    %c0_i32_76 = arith.constant 0 : i32
    %166 = arith.addi %165, %c0_i32_76 : i32
    %167 = arith.index_cast %166 : i32 to index
    %168 = memref.load %arg1[%167] : memref<128xi32, #tpu.memory_space<smem>>
    %169 = arith.index_cast %168 : i32 to index
    %c0_77 = arith.constant 0 : index
    %170 = vector.load %arg2[%169, %c0_77] : memref<128x128xf32, #tpu.memory_space<vmem>>, vector<1x128xf32>
    %c0_i32_78 = arith.constant 0 : i32
    %171 = arith.addi %164, %c0_i32_78 : i32
    %c1_i32_79 = arith.constant 1 : i32
    %172 = arith.addi %171, %c1_i32_79 : i32
    %173 = arith.index_cast %172 : i32 to index
    %174 = memref.load %arg1[%173] : memref<128xi32, #tpu.memory_space<smem>>
    %175 = arith.index_cast %174 : i32 to index
    %c0_80 = arith.constant 0 : index
    %176 = vector.load %arg2[%175, %c0_80] : memref<128x128xf32, #tpu.memory_space<vmem>>, vector<1x128xf32>
    %c0_i32_81 = arith.constant 0 : i32
    %177 = arith.addi %164, %c0_i32_81 : i32
    %c2_i32_82 = arith.constant 2 : i32
    %178 = arith.addi %177, %c2_i32_82 : i32
    %179 = arith.index_cast %178 : i32 to index
    %180 = memref.load %arg1[%179] : memref<128xi32, #tpu.memory_space<smem>>
    %181 = arith.index_cast %180 : i32 to index
    %c0_83 = arith.constant 0 : index
    %182 = vector.load %arg2[%181, %c0_83] : memref<128x128xf32, #tpu.memory_space<vmem>>, vector<1x128xf32>
    %c0_i32_84 = arith.constant 0 : i32
    %183 = arith.addi %164, %c0_i32_84 : i32
    %c3_i32_85 = arith.constant 3 : i32
    %184 = arith.addi %183, %c3_i32_85 : i32
    %185 = arith.index_cast %184 : i32 to index
    %186 = memref.load %arg1[%185] : memref<128xi32, #tpu.memory_space<smem>>
    %187 = arith.index_cast %186 : i32 to index
    %c0_86 = arith.constant 0 : index
    %188 = vector.load %arg2[%187, %c0_86] : memref<128x128xf32, #tpu.memory_space<vmem>>, vector<1x128xf32>
    %c0_i32_87 = arith.constant 0 : i32
    %189 = arith.addi %164, %c0_i32_87 : i32
    %c4_i32_88 = arith.constant 4 : i32
    %190 = arith.addi %189, %c4_i32_88 : i32
    %191 = arith.index_cast %190 : i32 to index
    %192 = memref.load %arg1[%191] : memref<128xi32, #tpu.memory_space<smem>>
    %193 = arith.index_cast %192 : i32 to index
    %c0_89 = arith.constant 0 : index
    %194 = vector.load %arg2[%193, %c0_89] : memref<128x128xf32, #tpu.memory_space<vmem>>, vector<1x128xf32>
    %c0_i32_90 = arith.constant 0 : i32
    %195 = arith.addi %164, %c0_i32_90 : i32
    %c5_i32_91 = arith.constant 5 : i32
    %196 = arith.addi %195, %c5_i32_91 : i32
    %197 = arith.index_cast %196 : i32 to index
    %198 = memref.load %arg1[%197] : memref<128xi32, #tpu.memory_space<smem>>
    %199 = arith.index_cast %198 : i32 to index
    %c0_92 = arith.constant 0 : index
    %200 = vector.load %arg2[%199, %c0_92] : memref<128x128xf32, #tpu.memory_space<vmem>>, vector<1x128xf32>
    %c0_i32_93 = arith.constant 0 : i32
    %201 = arith.addi %164, %c0_i32_93 : i32
    %c6_i32_94 = arith.constant 6 : i32
    %202 = arith.addi %201, %c6_i32_94 : i32
    %203 = arith.index_cast %202 : i32 to index
    %204 = memref.load %arg1[%203] : memref<128xi32, #tpu.memory_space<smem>>
    %205 = arith.index_cast %204 : i32 to index
    %c0_95 = arith.constant 0 : index
    %206 = vector.load %arg2[%205, %c0_95] : memref<128x128xf32, #tpu.memory_space<vmem>>, vector<1x128xf32>
    %c0_i32_96 = arith.constant 0 : i32
    %207 = arith.addi %164, %c0_i32_96 : i32
    %c7_i32_97 = arith.constant 7 : i32
    %208 = arith.addi %207, %c7_i32_97 : i32
    %209 = arith.index_cast %208 : i32 to index
    %210 = memref.load %arg1[%209] : memref<128xi32, #tpu.memory_space<smem>>
    %211 = arith.index_cast %210 : i32 to index
    %c0_98 = arith.constant 0 : index
    %212 = vector.load %arg2[%211, %c0_98] : memref<128x128xf32, #tpu.memory_space<vmem>>, vector<1x128xf32>
    %213 = tpu.concatenate %170, %176, %182, %188, %194, %200, %206, %212 in 0 : vector<1x128xf32>, vector<1x128xf32>, vector<1x128xf32>, vector<1x128xf32>, vector<1x128xf32>, vector<1x128xf32>, vector<1x128xf32>, vector<1x128xf32> -> vector<8x128xf32>
    %cst_99 = arith.constant dense<0.000000e+00> : vector<128xf32>
    %214 = vector.multi_reduction <add>, %213, %cst_99 [0] : vector<8x128xf32> to vector<128xf32>
    %215 = vector.shape_cast %214 : vector<128xf32> to vector<1x128xf32>
    %c16_i32_100 = arith.constant 16 : i32
    %216 = arith.muli %arg0, %c16_i32_100 : i32
    %c4_i32_101 = arith.constant 4 : i32
    %217 = arith.addi %216, %c4_i32_101 : i32
    %c8_i32_102 = arith.constant 8 : i32
    %218 = arith.muli %217, %c8_i32_102 : i32
    %c0_i32_103 = arith.constant 0 : i32
    %219 = arith.addi %218, %c0_i32_103 : i32
    %c0_i32_104 = arith.constant 0 : i32
    %220 = arith.addi %219, %c0_i32_104 : i32
    %221 = arith.index_cast %220 : i32 to index
    %222 = memref.load %arg1[%221] : memref<128xi32, #tpu.memory_space<smem>>
    %223 = arith.index_cast %222 : i32 to index
    %c0_105 = arith.constant 0 : index
    %224 = vector.load %arg2[%223, %c0_105] : memref<128x128xf32, #tpu.memory_space<vmem>>, vector<1x128xf32>
    %c0_i32_106 = arith.constant 0 : i32
    %225 = arith.addi %218, %c0_i32_106 : i32
    %c1_i32_107 = arith.constant 1 : i32
    %226 = arith.addi %225, %c1_i32_107 : i32
    %227 = arith.index_cast %226 : i32 to index
    %228 = memref.load %arg1[%227] : memref<128xi32, #tpu.memory_space<smem>>
    %229 = arith.index_cast %228 : i32 to index
    %c0_108 = arith.constant 0 : index
    %230 = vector.load %arg2[%229, %c0_108] : memref<128x128xf32, #tpu.memory_space<vmem>>, vector<1x128xf32>
    %c0_i32_109 = arith.constant 0 : i32
    %231 = arith.addi %218, %c0_i32_109 : i32
    %c2_i32_110 = arith.constant 2 : i32
    %232 = arith.addi %231, %c2_i32_110 : i32
    %233 = arith.index_cast %232 : i32 to index
    %234 = memref.load %arg1[%233] : memref<128xi32, #tpu.memory_space<smem>>
    %235 = arith.index_cast %234 : i32 to index
    %c0_111 = arith.constant 0 : index
    %236 = vector.load %arg2[%235, %c0_111] : memref<128x128xf32, #tpu.memory_space<vmem>>, vector<1x128xf32>
    %c0_i32_112 = arith.constant 0 : i32
    %237 = arith.addi %218, %c0_i32_112 : i32
    %c3_i32_113 = arith.constant 3 : i32
    %238 = arith.addi %237, %c3_i32_113 : i32
    %239 = arith.index_cast %238 : i32 to index
    %240 = memref.load %arg1[%239] : memref<128xi32, #tpu.memory_space<smem>>
    %241 = arith.index_cast %240 : i32 to index
    %c0_114 = arith.constant 0 : index
    %242 = vector.load %arg2[%241, %c0_114] : memref<128x128xf32, #tpu.memory_space<vmem>>, vector<1x128xf32>
    %c0_i32_115 = arith.constant 0 : i32
    %243 = arith.addi %218, %c0_i32_115 : i32
    %c4_i32_116 = arith.constant 4 : i32
    %244 = arith.addi %243, %c4_i32_116 : i32
    %245 = arith.index_cast %244 : i32 to index
    %246 = memref.load %arg1[%245] : memref<128xi32, #tpu.memory_space<smem>>
    %247 = arith.index_cast %246 : i32 to index
    %c0_117 = arith.constant 0 : index
    %248 = vector.load %arg2[%247, %c0_117] : memref<128x128xf32, #tpu.memory_space<vmem>>, vector<1x128xf32>
    %c0_i32_118 = arith.constant 0 : i32
    %249 = arith.addi %218, %c0_i32_118 : i32
    %c5_i32_119 = arith.constant 5 : i32
    %250 = arith.addi %249, %c5_i32_119 : i32
    %251 = arith.index_cast %250 : i32 to index
    %252 = memref.load %arg1[%251] : memref<128xi32, #tpu.memory_space<smem>>
    %253 = arith.index_cast %252 : i32 to index
    %c0_120 = arith.constant 0 : index
    %254 = vector.load %arg2[%253, %c0_120] : memref<128x128xf32, #tpu.memory_space<vmem>>, vector<1x128xf32>
    %c0_i32_121 = arith.constant 0 : i32
    %255 = arith.addi %218, %c0_i32_121 : i32
    %c6_i32_122 = arith.constant 6 : i32
    %256 = arith.addi %255, %c6_i32_122 : i32
    %257 = arith.index_cast %256 : i32 to index
    %258 = memref.load %arg1[%257] : memref<128xi32, #tpu.memory_space<smem>>
    %259 = arith.index_cast %258 : i32 to index
    %c0_123 = arith.constant 0 : index
    %260 = vector.load %arg2[%259, %c0_123] : memref<128x128xf32, #tpu.memory_space<vmem>>, vector<1x128xf32>
    %c0_i32_124 = arith.constant 0 : i32
    %261 = arith.addi %218, %c0_i32_124 : i32
    %c7_i32_125 = arith.constant 7 : i32
    %262 = arith.addi %261, %c7_i32_125 : i32
    %263 = arith.index_cast %262 : i32 to index
    %264 = memref.load %arg1[%263] : memref<128xi32, #tpu.memory_space<smem>>
    %265 = arith.index_cast %264 : i32 to index
    %c0_126 = arith.constant 0 : index
    %266 = vector.load %arg2[%265, %c0_126] : memref<128x128xf32, #tpu.memory_space<vmem>>, vector<1x128xf32>
    %267 = tpu.concatenate %224, %230, %236, %242, %248, %254, %260, %266 in 0 : vector<1x128xf32>, vector<1x128xf32>, vector<1x128xf32>, vector<1x128xf32>, vector<1x128xf32>, vector<1x128xf32>, vector<1x128xf32>, vector<1x128xf32> -> vector<8x128xf32>
    %cst_127 = arith.constant dense<0.000000e+00> : vector<128xf32>
    %268 = vector.multi_reduction <add>, %267, %cst_127 [0] : vector<8x128xf32> to vector<128xf32>
    %269 = vector.shape_cast %268 : vector<128xf32> to vector<1x128xf32>
    %c16_i32_128 = arith.constant 16 : i32
    %270 = arith.muli %arg0, %c16_i32_128 : i32
    %c5_i32_129 = arith.constant 5 : i32
    %271 = arith.addi %270, %c5_i32_129 : i32
    %c8_i32_130 = arith.constant 8 : i32
    %272 = arith.muli %271, %c8_i32_130 : i32
    %c0_i32_131 = arith.constant 0 : i32
    %273 = arith.addi %272, %c0_i32_131 : i32
    %c0_i32_132 = arith.constant 0 : i32
    %274 = arith.addi %273, %c0_i32_132 : i32
    %275 = arith.index_cast %274 : i32 to index
    %276 = memref.load %arg1[%275] : memref<128xi32, #tpu.memory_space<smem>>
    %277 = arith.index_cast %276 : i32 to index
    %c0_133 = arith.constant 0 : index
    %278 = vector.load %arg2[%277, %c0_133] : memref<128x128xf32, #tpu.memory_space<vmem>>, vector<1x128xf32>
    %c0_i32_134 = arith.constant 0 : i32
    %279 = arith.addi %272, %c0_i32_134 : i32
    %c1_i32_135 = arith.constant 1 : i32
    %280 = arith.addi %279, %c1_i32_135 : i32
    %281 = arith.index_cast %280 : i32 to index
    %282 = memref.load %arg1[%281] : memref<128xi32, #tpu.memory_space<smem>>
    %283 = arith.index_cast %282 : i32 to index
    %c0_136 = arith.constant 0 : index
    %284 = vector.load %arg2[%283, %c0_136] : memref<128x128xf32, #tpu.memory_space<vmem>>, vector<1x128xf32>
    %c0_i32_137 = arith.constant 0 : i32
    %285 = arith.addi %272, %c0_i32_137 : i32
    %c2_i32_138 = arith.constant 2 : i32
    %286 = arith.addi %285, %c2_i32_138 : i32
    %287 = arith.index_cast %286 : i32 to index
    %288 = memref.load %arg1[%287] : memref<128xi32, #tpu.memory_space<smem>>
    %289 = arith.index_cast %288 : i32 to index
    %c0_139 = arith.constant 0 : index
    %290 = vector.load %arg2[%289, %c0_139] : memref<128x128xf32, #tpu.memory_space<vmem>>, vector<1x128xf32>
    %c0_i32_140 = arith.constant 0 : i32
    %291 = arith.addi %272, %c0_i32_140 : i32
    %c3_i32_141 = arith.constant 3 : i32
    %292 = arith.addi %291, %c3_i32_141 : i32
    %293 = arith.index_cast %292 : i32 to index
    %294 = memref.load %arg1[%293] : memref<128xi32, #tpu.memory_space<smem>>
    %295 = arith.index_cast %294 : i32 to index
    %c0_142 = arith.constant 0 : index
    %296 = vector.load %arg2[%295, %c0_142] : memref<128x128xf32, #tpu.memory_space<vmem>>, vector<1x128xf32>
    %c0_i32_143 = arith.constant 0 : i32
    %297 = arith.addi %272, %c0_i32_143 : i32
    %c4_i32_144 = arith.constant 4 : i32
    %298 = arith.addi %297, %c4_i32_144 : i32
    %299 = arith.index_cast %298 : i32 to index
    %300 = memref.load %arg1[%299] : memref<128xi32, #tpu.memory_space<smem>>
    %301 = arith.index_cast %300 : i32 to index
    %c0_145 = arith.constant 0 : index
    %302 = vector.load %arg2[%301, %c0_145] : memref<128x128xf32, #tpu.memory_space<vmem>>, vector<1x128xf32>
    %c0_i32_146 = arith.constant 0 : i32
    %303 = arith.addi %272, %c0_i32_146 : i32
    %c5_i32_147 = arith.constant 5 : i32
    %304 = arith.addi %303, %c5_i32_147 : i32
    %305 = arith.index_cast %304 : i32 to index
    %306 = memref.load %arg1[%305] : memref<128xi32, #tpu.memory_space<smem>>
    %307 = arith.index_cast %306 : i32 to index
    %c0_148 = arith.constant 0 : index
    %308 = vector.load %arg2[%307, %c0_148] : memref<128x128xf32, #tpu.memory_space<vmem>>, vector<1x128xf32>
    %c0_i32_149 = arith.constant 0 : i32
    %309 = arith.addi %272, %c0_i32_149 : i32
    %c6_i32_150 = arith.constant 6 : i32
    %310 = arith.addi %309, %c6_i32_150 : i32
    %311 = arith.index_cast %310 : i32 to index
    %312 = memref.load %arg1[%311] : memref<128xi32, #tpu.memory_space<smem>>
    %313 = arith.index_cast %312 : i32 to index
    %c0_151 = arith.constant 0 : index
    %314 = vector.load %arg2[%313, %c0_151] : memref<128x128xf32, #tpu.memory_space<vmem>>, vector<1x128xf32>
    %c0_i32_152 = arith.constant 0 : i32
    %315 = arith.addi %272, %c0_i32_152 : i32
    %c7_i32_153 = arith.constant 7 : i32
    %316 = arith.addi %315, %c7_i32_153 : i32
    %317 = arith.index_cast %316 : i32 to index
    %318 = memref.load %arg1[%317] : memref<128xi32, #tpu.memory_space<smem>>
    %319 = arith.index_cast %318 : i32 to index
    %c0_154 = arith.constant 0 : index
    %320 = vector.load %arg2[%319, %c0_154] : memref<128x128xf32, #tpu.memory_space<vmem>>, vector<1x128xf32>
    %321 = tpu.concatenate %278, %284, %290, %296, %302, %308, %314, %320 in 0 : vector<1x128xf32>, vector<1x128xf32>, vector<1x128xf32>, vector<1x128xf32>, vector<1x128xf32>, vector<1x128xf32>, vector<1x128xf32>, vector<1x128xf32> -> vector<8x128xf32>
    %cst_155 = arith.constant dense<0.000000e+00> : vector<128xf32>
    %322 = vector.multi_reduction <add>, %321, %cst_155 [0] : vector<8x128xf32> to vector<128xf32>
    %323 = vector.shape_cast %322 : vector<128xf32> to vector<1x128xf32>
    %c16_i32_156 = arith.constant 16 : i32
    %324 = arith.muli %arg0, %c16_i32_156 : i32
    %c6_i32_157 = arith.constant 6 : i32
    %325 = arith.addi %324, %c6_i32_157 : i32
    %c8_i32_158 = arith.constant 8 : i32
    %326 = arith.muli %325, %c8_i32_158 : i32
    %c0_i32_159 = arith.constant 0 : i32
    %327 = arith.addi %326, %c0_i32_159 : i32
    %c0_i32_160 = arith.constant 0 : i32
    %328 = arith.addi %327, %c0_i32_160 : i32
    %329 = arith.index_cast %328 : i32 to index
    %330 = memref.load %arg1[%329] : memref<128xi32, #tpu.memory_space<smem>>
    %331 = arith.index_cast %330 : i32 to index
    %c0_161 = arith.constant 0 : index
    %332 = vector.load %arg2[%331, %c0_161] : memref<128x128xf32, #tpu.memory_space<vmem>>, vector<1x128xf32>
    %c0_i32_162 = arith.constant 0 : i32
    %333 = arith.addi %326, %c0_i32_162 : i32
    %c1_i32_163 = arith.constant 1 : i32
    %334 = arith.addi %333, %c1_i32_163 : i32
    %335 = arith.index_cast %334 : i32 to index
    %336 = memref.load %arg1[%335] : memref<128xi32, #tpu.memory_space<smem>>
    %337 = arith.index_cast %336 : i32 to index
    %c0_164 = arith.constant 0 : index
    %338 = vector.load %arg2[%337, %c0_164] : memref<128x128xf32, #tpu.memory_space<vmem>>, vector<1x128xf32>
    %c0_i32_165 = arith.constant 0 : i32
    %339 = arith.addi %326, %c0_i32_165 : i32
    %c2_i32_166 = arith.constant 2 : i32
    %340 = arith.addi %339, %c2_i32_166 : i32
    %341 = arith.index_cast %340 : i32 to index
    %342 = memref.load %arg1[%341] : memref<128xi32, #tpu.memory_space<smem>>
    %343 = arith.index_cast %342 : i32 to index
    %c0_167 = arith.constant 0 : index
    %344 = vector.load %arg2[%343, %c0_167] : memref<128x128xf32, #tpu.memory_space<vmem>>, vector<1x128xf32>
    %c0_i32_168 = arith.constant 0 : i32
    %345 = arith.addi %326, %c0_i32_168 : i32
    %c3_i32_169 = arith.constant 3 : i32
    %346 = arith.addi %345, %c3_i32_169 : i32
    %347 = arith.index_cast %346 : i32 to index
    %348 = memref.load %arg1[%347] : memref<128xi32, #tpu.memory_space<smem>>
    %349 = arith.index_cast %348 : i32 to index
    %c0_170 = arith.constant 0 : index
    %350 = vector.load %arg2[%349, %c0_170] : memref<128x128xf32, #tpu.memory_space<vmem>>, vector<1x128xf32>
    %c0_i32_171 = arith.constant 0 : i32
    %351 = arith.addi %326, %c0_i32_171 : i32
    %c4_i32_172 = arith.constant 4 : i32
    %352 = arith.addi %351, %c4_i32_172 : i32
    %353 = arith.index_cast %352 : i32 to index
    %354 = memref.load %arg1[%353] : memref<128xi32, #tpu.memory_space<smem>>
    %355 = arith.index_cast %354 : i32 to index
    %c0_173 = arith.constant 0 : index
    %356 = vector.load %arg2[%355, %c0_173] : memref<128x128xf32, #tpu.memory_space<vmem>>, vector<1x128xf32>
    %c0_i32_174 = arith.constant 0 : i32
    %357 = arith.addi %326, %c0_i32_174 : i32
    %c5_i32_175 = arith.constant 5 : i32
    %358 = arith.addi %357, %c5_i32_175 : i32
    %359 = arith.index_cast %358 : i32 to index
    %360 = memref.load %arg1[%359] : memref<128xi32, #tpu.memory_space<smem>>
    %361 = arith.index_cast %360 : i32 to index
    %c0_176 = arith.constant 0 : index
    %362 = vector.load %arg2[%361, %c0_176] : memref<128x128xf32, #tpu.memory_space<vmem>>, vector<1x128xf32>
    %c0_i32_177 = arith.constant 0 : i32
    %363 = arith.addi %326, %c0_i32_177 : i32
    %c6_i32_178 = arith.constant 6 : i32
    %364 = arith.addi %363, %c6_i32_178 : i32
    %365 = arith.index_cast %364 : i32 to index
    %366 = memref.load %arg1[%365] : memref<128xi32, #tpu.memory_space<smem>>
    %367 = arith.index_cast %366 : i32 to index
    %c0_179 = arith.constant 0 : index
    %368 = vector.load %arg2[%367, %c0_179] : memref<128x128xf32, #tpu.memory_space<vmem>>, vector<1x128xf32>
    %c0_i32_180 = arith.constant 0 : i32
    %369 = arith.addi %326, %c0_i32_180 : i32
    %c7_i32_181 = arith.constant 7 : i32
    %370 = arith.addi %369, %c7_i32_181 : i32
    %371 = arith.index_cast %370 : i32 to index
    %372 = memref.load %arg1[%371] : memref<128xi32, #tpu.memory_space<smem>>
    %373 = arith.index_cast %372 : i32 to index
    %c0_182 = arith.constant 0 : index
    %374 = vector.load %arg2[%373, %c0_182] : memref<128x128xf32, #tpu.memory_space<vmem>>, vector<1x128xf32>
    %375 = tpu.concatenate %332, %338, %344, %350, %356, %362, %368, %374 in 0 : vector<1x128xf32>, vector<1x128xf32>, vector<1x128xf32>, vector<1x128xf32>, vector<1x128xf32>, vector<1x128xf32>, vector<1x128xf32>, vector<1x128xf32> -> vector<8x128xf32>
    %cst_183 = arith.constant dense<0.000000e+00> : vector<128xf32>
    %376 = vector.multi_reduction <add>, %375, %cst_183 [0] : vector<8x128xf32> to vector<128xf32>
    %377 = vector.shape_cast %376 : vector<128xf32> to vector<1x128xf32>
    %c16_i32_184 = arith.constant 16 : i32
    %378 = arith.muli %arg0, %c16_i32_184 : i32
    %c7_i32_185 = arith.constant 7 : i32
    %379 = arith.addi %378, %c7_i32_185 : i32
    %c8_i32_186 = arith.constant 8 : i32
    %380 = arith.muli %379, %c8_i32_186 : i32
    %c0_i32_187 = arith.constant 0 : i32
    %381 = arith.addi %380, %c0_i32_187 : i32
    %c0_i32_188 = arith.constant 0 : i32
    %382 = arith.addi %381, %c0_i32_188 : i32
    %383 = arith.index_cast %382 : i32 to index
    %384 = memref.load %arg1[%383] : memref<128xi32, #tpu.memory_space<smem>>
    %385 = arith.index_cast %384 : i32 to index
    %c0_189 = arith.constant 0 : index
    %386 = vector.load %arg2[%385, %c0_189] : memref<128x128xf32, #tpu.memory_space<vmem>>, vector<1x128xf32>
    %c0_i32_190 = arith.constant 0 : i32
    %387 = arith.addi %380, %c0_i32_190 : i32
    %c1_i32_191 = arith.constant 1 : i32
    %388 = arith.addi %387, %c1_i32_191 : i32
    %389 = arith.index_cast %388 : i32 to index
    %390 = memref.load %arg1[%389] : memref<128xi32, #tpu.memory_space<smem>>
    %391 = arith.index_cast %390 : i32 to index
    %c0_192 = arith.constant 0 : index
    %392 = vector.load %arg2[%391, %c0_192] : memref<128x128xf32, #tpu.memory_space<vmem>>, vector<1x128xf32>
    %c0_i32_193 = arith.constant 0 : i32
    %393 = arith.addi %380, %c0_i32_193 : i32
    %c2_i32_194 = arith.constant 2 : i32
    %394 = arith.addi %393, %c2_i32_194 : i32
    %395 = arith.index_cast %394 : i32 to index
    %396 = memref.load %arg1[%395] : memref<128xi32, #tpu.memory_space<smem>>
    %397 = arith.index_cast %396 : i32 to index
    %c0_195 = arith.constant 0 : index
    %398 = vector.load %arg2[%397, %c0_195] : memref<128x128xf32, #tpu.memory_space<vmem>>, vector<1x128xf32>
    %c0_i32_196 = arith.constant 0 : i32
    %399 = arith.addi %380, %c0_i32_196 : i32
    %c3_i32_197 = arith.constant 3 : i32
    %400 = arith.addi %399, %c3_i32_197 : i32
    %401 = arith.index_cast %400 : i32 to index
    %402 = memref.load %arg1[%401] : memref<128xi32, #tpu.memory_space<smem>>
    %403 = arith.index_cast %402 : i32 to index
    %c0_198 = arith.constant 0 : index
    %404 = vector.load %arg2[%403, %c0_198] : memref<128x128xf32, #tpu.memory_space<vmem>>, vector<1x128xf32>
    %c0_i32_199 = arith.constant 0 : i32
    %405 = arith.addi %380, %c0_i32_199 : i32
    %c4_i32_200 = arith.constant 4 : i32
    %406 = arith.addi %405, %c4_i32_200 : i32
    %407 = arith.index_cast %406 : i32 to index
    %408 = memref.load %arg1[%407] : memref<128xi32, #tpu.memory_space<smem>>
    %409 = arith.index_cast %408 : i32 to index
    %c0_201 = arith.constant 0 : index
    %410 = vector.load %arg2[%409, %c0_201] : memref<128x128xf32, #tpu.memory_space<vmem>>, vector<1x128xf32>
    %c0_i32_202 = arith.constant 0 : i32
    %411 = arith.addi %380, %c0_i32_202 : i32
    %c5_i32_203 = arith.constant 5 : i32
    %412 = arith.addi %411, %c5_i32_203 : i32
    %413 = arith.index_cast %412 : i32 to index
    %414 = memref.load %arg1[%413] : memref<128xi32, #tpu.memory_space<smem>>
    %415 = arith.index_cast %414 : i32 to index
    %c0_204 = arith.constant 0 : index
    %416 = vector.load %arg2[%415, %c0_204] : memref<128x128xf32, #tpu.memory_space<vmem>>, vector<1x128xf32>
    %c0_i32_205 = arith.constant 0 : i32
    %417 = arith.addi %380, %c0_i32_205 : i32
    %c6_i32_206 = arith.constant 6 : i32
    %418 = arith.addi %417, %c6_i32_206 : i32
    %419 = arith.index_cast %418 : i32 to index
    %420 = memref.load %arg1[%419] : memref<128xi32, #tpu.memory_space<smem>>
    %421 = arith.index_cast %420 : i32 to index
    %c0_207 = arith.constant 0 : index
    %422 = vector.load %arg2[%421, %c0_207] : memref<128x128xf32, #tpu.memory_space<vmem>>, vector<1x128xf32>
    %c0_i32_208 = arith.constant 0 : i32
    %423 = arith.addi %380, %c0_i32_208 : i32
    %c7_i32_209 = arith.constant 7 : i32
    %424 = arith.addi %423, %c7_i32_209 : i32
    %425 = arith.index_cast %424 : i32 to index
    %426 = memref.load %arg1[%425] : memref<128xi32, #tpu.memory_space<smem>>
    %427 = arith.index_cast %426 : i32 to index
    %c0_210 = arith.constant 0 : index
    %428 = vector.load %arg2[%427, %c0_210] : memref<128x128xf32, #tpu.memory_space<vmem>>, vector<1x128xf32>
    %429 = tpu.concatenate %386, %392, %398, %404, %410, %416, %422, %428 in 0 : vector<1x128xf32>, vector<1x128xf32>, vector<1x128xf32>, vector<1x128xf32>, vector<1x128xf32>, vector<1x128xf32>, vector<1x128xf32>, vector<1x128xf32> -> vector<8x128xf32>
    %cst_211 = arith.constant dense<0.000000e+00> : vector<128xf32>
    %430 = vector.multi_reduction <add>, %429, %cst_211 [0] : vector<8x128xf32> to vector<128xf32>
    %431 = vector.shape_cast %430 : vector<128xf32> to vector<1x128xf32>
    %c16_i32_212 = arith.constant 16 : i32
    %432 = arith.muli %arg0, %c16_i32_212 : i32
    %c8_i32_213 = arith.constant 8 : i32
    %433 = arith.addi %432, %c8_i32_213 : i32
    %c8_i32_214 = arith.constant 8 : i32
    %434 = arith.muli %433, %c8_i32_214 : i32
    %c0_i32_215 = arith.constant 0 : i32
    %435 = arith.addi %434, %c0_i32_215 : i32
    %c0_i32_216 = arith.constant 0 : i32
    %436 = arith.addi %435, %c0_i32_216 : i32
    %437 = arith.index_cast %436 : i32 to index
    %438 = memref.load %arg1[%437] : memref<128xi32, #tpu.memory_space<smem>>
    %439 = arith.index_cast %438 : i32 to index
    %c0_217 = arith.constant 0 : index
    %440 = vector.load %arg2[%439, %c0_217] : memref<128x128xf32, #tpu.memory_space<vmem>>, vector<1x128xf32>
    %c0_i32_218 = arith.constant 0 : i32
    %441 = arith.addi %434, %c0_i32_218 : i32
    %c1_i32_219 = arith.constant 1 : i32
    %442 = arith.addi %441, %c1_i32_219 : i32
    %443 = arith.index_cast %442 : i32 to index
    %444 = memref.load %arg1[%443] : memref<128xi32, #tpu.memory_space<smem>>
    %445 = arith.index_cast %444 : i32 to index
    %c0_220 = arith.constant 0 : index
    %446 = vector.load %arg2[%445, %c0_220] : memref<128x128xf32, #tpu.memory_space<vmem>>, vector<1x128xf32>
    %c0_i32_221 = arith.constant 0 : i32
    %447 = arith.addi %434, %c0_i32_221 : i32
    %c2_i32_222 = arith.constant 2 : i32
    %448 = arith.addi %447, %c2_i32_222 : i32
    %449 = arith.index_cast %448 : i32 to index
    %450 = memref.load %arg1[%449] : memref<128xi32, #tpu.memory_space<smem>>
    %451 = arith.index_cast %450 : i32 to index
    %c0_223 = arith.constant 0 : index
    %452 = vector.load %arg2[%451, %c0_223] : memref<128x128xf32, #tpu.memory_space<vmem>>, vector<1x128xf32>
    %c0_i32_224 = arith.constant 0 : i32
    %453 = arith.addi %434, %c0_i32_224 : i32
    %c3_i32_225 = arith.constant 3 : i32
    %454 = arith.addi %453, %c3_i32_225 : i32
    %455 = arith.index_cast %454 : i32 to index
    %456 = memref.load %arg1[%455] : memref<128xi32, #tpu.memory_space<smem>>
    %457 = arith.index_cast %456 : i32 to index
    %c0_226 = arith.constant 0 : index
    %458 = vector.load %arg2[%457, %c0_226] : memref<128x128xf32, #tpu.memory_space<vmem>>, vector<1x128xf32>
    %c0_i32_227 = arith.constant 0 : i32
    %459 = arith.addi %434, %c0_i32_227 : i32
    %c4_i32_228 = arith.constant 4 : i32
    %460 = arith.addi %459, %c4_i32_228 : i32
    %461 = arith.index_cast %460 : i32 to index
    %462 = memref.load %arg1[%461] : memref<128xi32, #tpu.memory_space<smem>>
    %463 = arith.index_cast %462 : i32 to index
    %c0_229 = arith.constant 0 : index
    %464 = vector.load %arg2[%463, %c0_229] : memref<128x128xf32, #tpu.memory_space<vmem>>, vector<1x128xf32>
    %c0_i32_230 = arith.constant 0 : i32
    %465 = arith.addi %434, %c0_i32_230 : i32
    %c5_i32_231 = arith.constant 5 : i32
    %466 = arith.addi %465, %c5_i32_231 : i32
    %467 = arith.index_cast %466 : i32 to index
    %468 = memref.load %arg1[%467] : memref<128xi32, #tpu.memory_space<smem>>
    %469 = arith.index_cast %468 : i32 to index
    %c0_232 = arith.constant 0 : index
    %470 = vector.load %arg2[%469, %c0_232] : memref<128x128xf32, #tpu.memory_space<vmem>>, vector<1x128xf32>
    %c0_i32_233 = arith.constant 0 : i32
    %471 = arith.addi %434, %c0_i32_233 : i32
    %c6_i32_234 = arith.constant 6 : i32
    %472 = arith.addi %471, %c6_i32_234 : i32
    %473 = arith.index_cast %472 : i32 to index
    %474 = memref.load %arg1[%473] : memref<128xi32, #tpu.memory_space<smem>>
    %475 = arith.index_cast %474 : i32 to index
    %c0_235 = arith.constant 0 : index
    %476 = vector.load %arg2[%475, %c0_235] : memref<128x128xf32, #tpu.memory_space<vmem>>, vector<1x128xf32>
    %c0_i32_236 = arith.constant 0 : i32
    %477 = arith.addi %434, %c0_i32_236 : i32
    %c7_i32_237 = arith.constant 7 : i32
    %478 = arith.addi %477, %c7_i32_237 : i32
    %479 = arith.index_cast %478 : i32 to index
    %480 = memref.load %arg1[%479] : memref<128xi32, #tpu.memory_space<smem>>
    %481 = arith.index_cast %480 : i32 to index
    %c0_238 = arith.constant 0 : index
    %482 = vector.load %arg2[%481, %c0_238] : memref<128x128xf32, #tpu.memory_space<vmem>>, vector<1x128xf32>
    %483 = tpu.concatenate %440, %446, %452, %458, %464, %470, %476, %482 in 0 : vector<1x128xf32>, vector<1x128xf32>, vector<1x128xf32>, vector<1x128xf32>, vector<1x128xf32>, vector<1x128xf32>, vector<1x128xf32>, vector<1x128xf32> -> vector<8x128xf32>
    %cst_239 = arith.constant dense<0.000000e+00> : vector<128xf32>
    %484 = vector.multi_reduction <add>, %483, %cst_239 [0] : vector<8x128xf32> to vector<128xf32>
    %485 = vector.shape_cast %484 : vector<128xf32> to vector<1x128xf32>
    %c16_i32_240 = arith.constant 16 : i32
    %486 = arith.muli %arg0, %c16_i32_240 : i32
    %c9_i32 = arith.constant 9 : i32
    %487 = arith.addi %486, %c9_i32 : i32
    %c8_i32_241 = arith.constant 8 : i32
    %488 = arith.muli %487, %c8_i32_241 : i32
    %c0_i32_242 = arith.constant 0 : i32
    %489 = arith.addi %488, %c0_i32_242 : i32
    %c0_i32_243 = arith.constant 0 : i32
    %490 = arith.addi %489, %c0_i32_243 : i32
    %491 = arith.index_cast %490 : i32 to index
    %492 = memref.load %arg1[%491] : memref<128xi32, #tpu.memory_space<smem>>
    %493 = arith.index_cast %492 : i32 to index
    %c0_244 = arith.constant 0 : index
    %494 = vector.load %arg2[%493, %c0_244] : memref<128x128xf32, #tpu.memory_space<vmem>>, vector<1x128xf32>
    %c0_i32_245 = arith.constant 0 : i32
    %495 = arith.addi %488, %c0_i32_245 : i32
    %c1_i32_246 = arith.constant 1 : i32
    %496 = arith.addi %495, %c1_i32_246 : i32
    %497 = arith.index_cast %496 : i32 to index
    %498 = memref.load %arg1[%497] : memref<128xi32, #tpu.memory_space<smem>>
    %499 = arith.index_cast %498 : i32 to index
    %c0_247 = arith.constant 0 : index
    %500 = vector.load %arg2[%499, %c0_247] : memref<128x128xf32, #tpu.memory_space<vmem>>, vector<1x128xf32>
    %c0_i32_248 = arith.constant 0 : i32
    %501 = arith.addi %488, %c0_i32_248 : i32
    %c2_i32_249 = arith.constant 2 : i32
    %502 = arith.addi %501, %c2_i32_249 : i32
    %503 = arith.index_cast %502 : i32 to index
    %504 = memref.load %arg1[%503] : memref<128xi32, #tpu.memory_space<smem>>
    %505 = arith.index_cast %504 : i32 to index
    %c0_250 = arith.constant 0 : index
    %506 = vector.load %arg2[%505, %c0_250] : memref<128x128xf32, #tpu.memory_space<vmem>>, vector<1x128xf32>
    %c0_i32_251 = arith.constant 0 : i32
    %507 = arith.addi %488, %c0_i32_251 : i32
    %c3_i32_252 = arith.constant 3 : i32
    %508 = arith.addi %507, %c3_i32_252 : i32
    %509 = arith.index_cast %508 : i32 to index
    %510 = memref.load %arg1[%509] : memref<128xi32, #tpu.memory_space<smem>>
    %511 = arith.index_cast %510 : i32 to index
    %c0_253 = arith.constant 0 : index
    %512 = vector.load %arg2[%511, %c0_253] : memref<128x128xf32, #tpu.memory_space<vmem>>, vector<1x128xf32>
    %c0_i32_254 = arith.constant 0 : i32
    %513 = arith.addi %488, %c0_i32_254 : i32
    %c4_i32_255 = arith.constant 4 : i32
    %514 = arith.addi %513, %c4_i32_255 : i32
    %515 = arith.index_cast %514 : i32 to index
    %516 = memref.load %arg1[%515] : memref<128xi32, #tpu.memory_space<smem>>
    %517 = arith.index_cast %516 : i32 to index
    %c0_256 = arith.constant 0 : index
    %518 = vector.load %arg2[%517, %c0_256] : memref<128x128xf32, #tpu.memory_space<vmem>>, vector<1x128xf32>
    %c0_i32_257 = arith.constant 0 : i32
    %519 = arith.addi %488, %c0_i32_257 : i32
    %c5_i32_258 = arith.constant 5 : i32
    %520 = arith.addi %519, %c5_i32_258 : i32
    %521 = arith.index_cast %520 : i32 to index
    %522 = memref.load %arg1[%521] : memref<128xi32, #tpu.memory_space<smem>>
    %523 = arith.index_cast %522 : i32 to index
    %c0_259 = arith.constant 0 : index
    %524 = vector.load %arg2[%523, %c0_259] : memref<128x128xf32, #tpu.memory_space<vmem>>, vector<1x128xf32>
    %c0_i32_260 = arith.constant 0 : i32
    %525 = arith.addi %488, %c0_i32_260 : i32
    %c6_i32_261 = arith.constant 6 : i32
    %526 = arith.addi %525, %c6_i32_261 : i32
    %527 = arith.index_cast %526 : i32 to index
    %528 = memref.load %arg1[%527] : memref<128xi32, #tpu.memory_space<smem>>
    %529 = arith.index_cast %528 : i32 to index
    %c0_262 = arith.constant 0 : index
    %530 = vector.load %arg2[%529, %c0_262] : memref<128x128xf32, #tpu.memory_space<vmem>>, vector<1x128xf32>
    %c0_i32_263 = arith.constant 0 : i32
    %531 = arith.addi %488, %c0_i32_263 : i32
    %c7_i32_264 = arith.constant 7 : i32
    %532 = arith.addi %531, %c7_i32_264 : i32
    %533 = arith.index_cast %532 : i32 to index
    %534 = memref.load %arg1[%533] : memref<128xi32, #tpu.memory_space<smem>>
    %535 = arith.index_cast %534 : i32 to index
    %c0_265 = arith.constant 0 : index
    %536 = vector.load %arg2[%535, %c0_265] : memref<128x128xf32, #tpu.memory_space<vmem>>, vector<1x128xf32>
    %537 = tpu.concatenate %494, %500, %506, %512, %518, %524, %530, %536 in 0 : vector<1x128xf32>, vector<1x128xf32>, vector<1x128xf32>, vector<1x128xf32>, vector<1x128xf32>, vector<1x128xf32>, vector<1x128xf32>, vector<1x128xf32> -> vector<8x128xf32>
    %cst_266 = arith.constant dense<0.000000e+00> : vector<128xf32>
    %538 = vector.multi_reduction <add>, %537, %cst_266 [0] : vector<8x128xf32> to vector<128xf32>
    %539 = vector.shape_cast %538 : vector<128xf32> to vector<1x128xf32>
    %c16_i32_267 = arith.constant 16 : i32
    %540 = arith.muli %arg0, %c16_i32_267 : i32
    %c10_i32 = arith.constant 10 : i32
    %541 = arith.addi %540, %c10_i32 : i32
    %c8_i32_268 = arith.constant 8 : i32
    %542 = arith.muli %541, %c8_i32_268 : i32
    %c0_i32_269 = arith.constant 0 : i32
    %543 = arith.addi %542, %c0_i32_269 : i32
    %c0_i32_270 = arith.constant 0 : i32
    %544 = arith.addi %543, %c0_i32_270 : i32
    %545 = arith.index_cast %544 : i32 to index
    %546 = memref.load %arg1[%545] : memref<128xi32, #tpu.memory_space<smem>>
    %547 = arith.index_cast %546 : i32 to index
    %c0_271 = arith.constant 0 : index
    %548 = vector.load %arg2[%547, %c0_271] : memref<128x128xf32, #tpu.memory_space<vmem>>, vector<1x128xf32>
    %c0_i32_272 = arith.constant 0 : i32
    %549 = arith.addi %542, %c0_i32_272 : i32
    %c1_i32_273 = arith.constant 1 : i32
    %550 = arith.addi %549, %c1_i32_273 : i32
    %551 = arith.index_cast %550 : i32 to index
    %552 = memref.load %arg1[%551] : memref<128xi32, #tpu.memory_space<smem>>
    %553 = arith.index_cast %552 : i32 to index
    %c0_274 = arith.constant 0 : index
    %554 = vector.load %arg2[%553, %c0_274] : memref<128x128xf32, #tpu.memory_space<vmem>>, vector<1x128xf32>
    %c0_i32_275 = arith.constant 0 : i32
    %555 = arith.addi %542, %c0_i32_275 : i32
    %c2_i32_276 = arith.constant 2 : i32
    %556 = arith.addi %555, %c2_i32_276 : i32
    %557 = arith.index_cast %556 : i32 to index
    %558 = memref.load %arg1[%557] : memref<128xi32, #tpu.memory_space<smem>>
    %559 = arith.index_cast %558 : i32 to index
    %c0_277 = arith.constant 0 : index
    %560 = vector.load %arg2[%559, %c0_277] : memref<128x128xf32, #tpu.memory_space<vmem>>, vector<1x128xf32>
    %c0_i32_278 = arith.constant 0 : i32
    %561 = arith.addi %542, %c0_i32_278 : i32
    %c3_i32_279 = arith.constant 3 : i32
    %562 = arith.addi %561, %c3_i32_279 : i32
    %563 = arith.index_cast %562 : i32 to index
    %564 = memref.load %arg1[%563] : memref<128xi32, #tpu.memory_space<smem>>
    %565 = arith.index_cast %564 : i32 to index
    %c0_280 = arith.constant 0 : index
    %566 = vector.load %arg2[%565, %c0_280] : memref<128x128xf32, #tpu.memory_space<vmem>>, vector<1x128xf32>
    %c0_i32_281 = arith.constant 0 : i32
    %567 = arith.addi %542, %c0_i32_281 : i32
    %c4_i32_282 = arith.constant 4 : i32
    %568 = arith.addi %567, %c4_i32_282 : i32
    %569 = arith.index_cast %568 : i32 to index
    %570 = memref.load %arg1[%569] : memref<128xi32, #tpu.memory_space<smem>>
    %571 = arith.index_cast %570 : i32 to index
    %c0_283 = arith.constant 0 : index
    %572 = vector.load %arg2[%571, %c0_283] : memref<128x128xf32, #tpu.memory_space<vmem>>, vector<1x128xf32>
    %c0_i32_284 = arith.constant 0 : i32
    %573 = arith.addi %542, %c0_i32_284 : i32
    %c5_i32_285 = arith.constant 5 : i32
    %574 = arith.addi %573, %c5_i32_285 : i32
    %575 = arith.index_cast %574 : i32 to index
    %576 = memref.load %arg1[%575] : memref<128xi32, #tpu.memory_space<smem>>
    %577 = arith.index_cast %576 : i32 to index
    %c0_286 = arith.constant 0 : index
    %578 = vector.load %arg2[%577, %c0_286] : memref<128x128xf32, #tpu.memory_space<vmem>>, vector<1x128xf32>
    %c0_i32_287 = arith.constant 0 : i32
    %579 = arith.addi %542, %c0_i32_287 : i32
    %c6_i32_288 = arith.constant 6 : i32
    %580 = arith.addi %579, %c6_i32_288 : i32
    %581 = arith.index_cast %580 : i32 to index
    %582 = memref.load %arg1[%581] : memref<128xi32, #tpu.memory_space<smem>>
    %583 = arith.index_cast %582 : i32 to index
    %c0_289 = arith.constant 0 : index
    %584 = vector.load %arg2[%583, %c0_289] : memref<128x128xf32, #tpu.memory_space<vmem>>, vector<1x128xf32>
    %c0_i32_290 = arith.constant 0 : i32
    %585 = arith.addi %542, %c0_i32_290 : i32
    %c7_i32_291 = arith.constant 7 : i32
    %586 = arith.addi %585, %c7_i32_291 : i32
    %587 = arith.index_cast %586 : i32 to index
    %588 = memref.load %arg1[%587] : memref<128xi32, #tpu.memory_space<smem>>
    %589 = arith.index_cast %588 : i32 to index
    %c0_292 = arith.constant 0 : index
    %590 = vector.load %arg2[%589, %c0_292] : memref<128x128xf32, #tpu.memory_space<vmem>>, vector<1x128xf32>
    %591 = tpu.concatenate %548, %554, %560, %566, %572, %578, %584, %590 in 0 : vector<1x128xf32>, vector<1x128xf32>, vector<1x128xf32>, vector<1x128xf32>, vector<1x128xf32>, vector<1x128xf32>, vector<1x128xf32>, vector<1x128xf32> -> vector<8x128xf32>
    %cst_293 = arith.constant dense<0.000000e+00> : vector<128xf32>
    %592 = vector.multi_reduction <add>, %591, %cst_293 [0] : vector<8x128xf32> to vector<128xf32>
    %593 = vector.shape_cast %592 : vector<128xf32> to vector<1x128xf32>
    %c16_i32_294 = arith.constant 16 : i32
    %594 = arith.muli %arg0, %c16_i32_294 : i32
    %c11_i32 = arith.constant 11 : i32
    %595 = arith.addi %594, %c11_i32 : i32
    %c8_i32_295 = arith.constant 8 : i32
    %596 = arith.muli %595, %c8_i32_295 : i32
    %c0_i32_296 = arith.constant 0 : i32
    %597 = arith.addi %596, %c0_i32_296 : i32
    %c0_i32_297 = arith.constant 0 : i32
    %598 = arith.addi %597, %c0_i32_297 : i32
    %599 = arith.index_cast %598 : i32 to index
    %600 = memref.load %arg1[%599] : memref<128xi32, #tpu.memory_space<smem>>
    %601 = arith.index_cast %600 : i32 to index
    %c0_298 = arith.constant 0 : index
    %602 = vector.load %arg2[%601, %c0_298] : memref<128x128xf32, #tpu.memory_space<vmem>>, vector<1x128xf32>
    %c0_i32_299 = arith.constant 0 : i32
    %603 = arith.addi %596, %c0_i32_299 : i32
    %c1_i32_300 = arith.constant 1 : i32
    %604 = arith.addi %603, %c1_i32_300 : i32
    %605 = arith.index_cast %604 : i32 to index
    %606 = memref.load %arg1[%605] : memref<128xi32, #tpu.memory_space<smem>>
    %607 = arith.index_cast %606 : i32 to index
    %c0_301 = arith.constant 0 : index
    %608 = vector.load %arg2[%607, %c0_301] : memref<128x128xf32, #tpu.memory_space<vmem>>, vector<1x128xf32>
    %c0_i32_302 = arith.constant 0 : i32
    %609 = arith.addi %596, %c0_i32_302 : i32
    %c2_i32_303 = arith.constant 2 : i32
    %610 = arith.addi %609, %c2_i32_303 : i32
    %611 = arith.index_cast %610 : i32 to index
    %612 = memref.load %arg1[%611] : memref<128xi32, #tpu.memory_space<smem>>
    %613 = arith.index_cast %612 : i32 to index
    %c0_304 = arith.constant 0 : index
    %614 = vector.load %arg2[%613, %c0_304] : memref<128x128xf32, #tpu.memory_space<vmem>>, vector<1x128xf32>
    %c0_i32_305 = arith.constant 0 : i32
    %615 = arith.addi %596, %c0_i32_305 : i32
    %c3_i32_306 = arith.constant 3 : i32
    %616 = arith.addi %615, %c3_i32_306 : i32
    %617 = arith.index_cast %616 : i32 to index
    %618 = memref.load %arg1[%617] : memref<128xi32, #tpu.memory_space<smem>>
    %619 = arith.index_cast %618 : i32 to index
    %c0_307 = arith.constant 0 : index
    %620 = vector.load %arg2[%619, %c0_307] : memref<128x128xf32, #tpu.memory_space<vmem>>, vector<1x128xf32>
    %c0_i32_308 = arith.constant 0 : i32
    %621 = arith.addi %596, %c0_i32_308 : i32
    %c4_i32_309 = arith.constant 4 : i32
    %622 = arith.addi %621, %c4_i32_309 : i32
    %623 = arith.index_cast %622 : i32 to index
    %624 = memref.load %arg1[%623] : memref<128xi32, #tpu.memory_space<smem>>
    %625 = arith.index_cast %624 : i32 to index
    %c0_310 = arith.constant 0 : index
    %626 = vector.load %arg2[%625, %c0_310] : memref<128x128xf32, #tpu.memory_space<vmem>>, vector<1x128xf32>
    %c0_i32_311 = arith.constant 0 : i32
    %627 = arith.addi %596, %c0_i32_311 : i32
    %c5_i32_312 = arith.constant 5 : i32
    %628 = arith.addi %627, %c5_i32_312 : i32
    %629 = arith.index_cast %628 : i32 to index
    %630 = memref.load %arg1[%629] : memref<128xi32, #tpu.memory_space<smem>>
    %631 = arith.index_cast %630 : i32 to index
    %c0_313 = arith.constant 0 : index
    %632 = vector.load %arg2[%631, %c0_313] : memref<128x128xf32, #tpu.memory_space<vmem>>, vector<1x128xf32>
    %c0_i32_314 = arith.constant 0 : i32
    %633 = arith.addi %596, %c0_i32_314 : i32
    %c6_i32_315 = arith.constant 6 : i32
    %634 = arith.addi %633, %c6_i32_315 : i32
    %635 = arith.index_cast %634 : i32 to index
    %636 = memref.load %arg1[%635] : memref<128xi32, #tpu.memory_space<smem>>
    %637 = arith.index_cast %636 : i32 to index
    %c0_316 = arith.constant 0 : index
    %638 = vector.load %arg2[%637, %c0_316] : memref<128x128xf32, #tpu.memory_space<vmem>>, vector<1x128xf32>
    %c0_i32_317 = arith.constant 0 : i32
    %639 = arith.addi %596, %c0_i32_317 : i32
    %c7_i32_318 = arith.constant 7 : i32
    %640 = arith.addi %639, %c7_i32_318 : i32
    %641 = arith.index_cast %640 : i32 to index
    %642 = memref.load %arg1[%641] : memref<128xi32, #tpu.memory_space<smem>>
    %643 = arith.index_cast %642 : i32 to index
    %c0_319 = arith.constant 0 : index
    %644 = vector.load %arg2[%643, %c0_319] : memref<128x128xf32, #tpu.memory_space<vmem>>, vector<1x128xf32>
    %645 = tpu.concatenate %602, %608, %614, %620, %626, %632, %638, %644 in 0 : vector<1x128xf32>, vector<1x128xf32>, vector<1x128xf32>, vector<1x128xf32>, vector<1x128xf32>, vector<1x128xf32>, vector<1x128xf32>, vector<1x128xf32> -> vector<8x128xf32>
    %cst_320 = arith.constant dense<0.000000e+00> : vector<128xf32>
    %646 = vector.multi_reduction <add>, %645, %cst_320 [0] : vector<8x128xf32> to vector<128xf32>
    %647 = vector.shape_cast %646 : vector<128xf32> to vector<1x128xf32>
    %c16_i32_321 = arith.constant 16 : i32
    %648 = arith.muli %arg0, %c16_i32_321 : i32
    %c12_i32 = arith.constant 12 : i32
    %649 = arith.addi %648, %c12_i32 : i32
    %c8_i32_322 = arith.constant 8 : i32
    %650 = arith.muli %649, %c8_i32_322 : i32
    %c0_i32_323 = arith.constant 0 : i32
    %651 = arith.addi %650, %c0_i32_323 : i32
    %c0_i32_324 = arith.constant 0 : i32
    %652 = arith.addi %651, %c0_i32_324 : i32
    %653 = arith.index_cast %652 : i32 to index
    %654 = memref.load %arg1[%653] : memref<128xi32, #tpu.memory_space<smem>>
    %655 = arith.index_cast %654 : i32 to index
    %c0_325 = arith.constant 0 : index
    %656 = vector.load %arg2[%655, %c0_325] : memref<128x128xf32, #tpu.memory_space<vmem>>, vector<1x128xf32>
    %c0_i32_326 = arith.constant 0 : i32
    %657 = arith.addi %650, %c0_i32_326 : i32
    %c1_i32_327 = arith.constant 1 : i32
    %658 = arith.addi %657, %c1_i32_327 : i32
    %659 = arith.index_cast %658 : i32 to index
    %660 = memref.load %arg1[%659] : memref<128xi32, #tpu.memory_space<smem>>
    %661 = arith.index_cast %660 : i32 to index
    %c0_328 = arith.constant 0 : index
    %662 = vector.load %arg2[%661, %c0_328] : memref<128x128xf32, #tpu.memory_space<vmem>>, vector<1x128xf32>
    %c0_i32_329 = arith.constant 0 : i32
    %663 = arith.addi %650, %c0_i32_329 : i32
    %c2_i32_330 = arith.constant 2 : i32
    %664 = arith.addi %663, %c2_i32_330 : i32
    %665 = arith.index_cast %664 : i32 to index
    %666 = memref.load %arg1[%665] : memref<128xi32, #tpu.memory_space<smem>>
    %667 = arith.index_cast %666 : i32 to index
    %c0_331 = arith.constant 0 : index
    %668 = vector.load %arg2[%667, %c0_331] : memref<128x128xf32, #tpu.memory_space<vmem>>, vector<1x128xf32>
    %c0_i32_332 = arith.constant 0 : i32
    %669 = arith.addi %650, %c0_i32_332 : i32
    %c3_i32_333 = arith.constant 3 : i32
    %670 = arith.addi %669, %c3_i32_333 : i32
    %671 = arith.index_cast %670 : i32 to index
    %672 = memref.load %arg1[%671] : memref<128xi32, #tpu.memory_space<smem>>
    %673 = arith.index_cast %672 : i32 to index
    %c0_334 = arith.constant 0 : index
    %674 = vector.load %arg2[%673, %c0_334] : memref<128x128xf32, #tpu.memory_space<vmem>>, vector<1x128xf32>
    %c0_i32_335 = arith.constant 0 : i32
    %675 = arith.addi %650, %c0_i32_335 : i32
    %c4_i32_336 = arith.constant 4 : i32
    %676 = arith.addi %675, %c4_i32_336 : i32
    %677 = arith.index_cast %676 : i32 to index
    %678 = memref.load %arg1[%677] : memref<128xi32, #tpu.memory_space<smem>>
    %679 = arith.index_cast %678 : i32 to index
    %c0_337 = arith.constant 0 : index
    %680 = vector.load %arg2[%679, %c0_337] : memref<128x128xf32, #tpu.memory_space<vmem>>, vector<1x128xf32>
    %c0_i32_338 = arith.constant 0 : i32
    %681 = arith.addi %650, %c0_i32_338 : i32
    %c5_i32_339 = arith.constant 5 : i32
    %682 = arith.addi %681, %c5_i32_339 : i32
    %683 = arith.index_cast %682 : i32 to index
    %684 = memref.load %arg1[%683] : memref<128xi32, #tpu.memory_space<smem>>
    %685 = arith.index_cast %684 : i32 to index
    %c0_340 = arith.constant 0 : index
    %686 = vector.load %arg2[%685, %c0_340] : memref<128x128xf32, #tpu.memory_space<vmem>>, vector<1x128xf32>
    %c0_i32_341 = arith.constant 0 : i32
    %687 = arith.addi %650, %c0_i32_341 : i32
    %c6_i32_342 = arith.constant 6 : i32
    %688 = arith.addi %687, %c6_i32_342 : i32
    %689 = arith.index_cast %688 : i32 to index
    %690 = memref.load %arg1[%689] : memref<128xi32, #tpu.memory_space<smem>>
    %691 = arith.index_cast %690 : i32 to index
    %c0_343 = arith.constant 0 : index
    %692 = vector.load %arg2[%691, %c0_343] : memref<128x128xf32, #tpu.memory_space<vmem>>, vector<1x128xf32>
    %c0_i32_344 = arith.constant 0 : i32
    %693 = arith.addi %650, %c0_i32_344 : i32
    %c7_i32_345 = arith.constant 7 : i32
    %694 = arith.addi %693, %c7_i32_345 : i32
    %695 = arith.index_cast %694 : i32 to index
    %696 = memref.load %arg1[%695] : memref<128xi32, #tpu.memory_space<smem>>
    %697 = arith.index_cast %696 : i32 to index
    %c0_346 = arith.constant 0 : index
    %698 = vector.load %arg2[%697, %c0_346] : memref<128x128xf32, #tpu.memory_space<vmem>>, vector<1x128xf32>
    %699 = tpu.concatenate %656, %662, %668, %674, %680, %686, %692, %698 in 0 : vector<1x128xf32>, vector<1x128xf32>, vector<1x128xf32>, vector<1x128xf32>, vector<1x128xf32>, vector<1x128xf32>, vector<1x128xf32>, vector<1x128xf32> -> vector<8x128xf32>
    %cst_347 = arith.constant dense<0.000000e+00> : vector<128xf32>
    %700 = vector.multi_reduction <add>, %699, %cst_347 [0] : vector<8x128xf32> to vector<128xf32>
    %701 = vector.shape_cast %700 : vector<128xf32> to vector<1x128xf32>
    %c16_i32_348 = arith.constant 16 : i32
    %702 = arith.muli %arg0, %c16_i32_348 : i32
    %c13_i32 = arith.constant 13 : i32
    %703 = arith.addi %702, %c13_i32 : i32
    %c8_i32_349 = arith.constant 8 : i32
    %704 = arith.muli %703, %c8_i32_349 : i32
    %c0_i32_350 = arith.constant 0 : i32
    %705 = arith.addi %704, %c0_i32_350 : i32
    %c0_i32_351 = arith.constant 0 : i32
    %706 = arith.addi %705, %c0_i32_351 : i32
    %707 = arith.index_cast %706 : i32 to index
    %708 = memref.load %arg1[%707] : memref<128xi32, #tpu.memory_space<smem>>
    %709 = arith.index_cast %708 : i32 to index
    %c0_352 = arith.constant 0 : index
    %710 = vector.load %arg2[%709, %c0_352] : memref<128x128xf32, #tpu.memory_space<vmem>>, vector<1x128xf32>
    %c0_i32_353 = arith.constant 0 : i32
    %711 = arith.addi %704, %c0_i32_353 : i32
    %c1_i32_354 = arith.constant 1 : i32
    %712 = arith.addi %711, %c1_i32_354 : i32
    %713 = arith.index_cast %712 : i32 to index
    %714 = memref.load %arg1[%713] : memref<128xi32, #tpu.memory_space<smem>>
    %715 = arith.index_cast %714 : i32 to index
    %c0_355 = arith.constant 0 : index
    %716 = vector.load %arg2[%715, %c0_355] : memref<128x128xf32, #tpu.memory_space<vmem>>, vector<1x128xf32>
    %c0_i32_356 = arith.constant 0 : i32
    %717 = arith.addi %704, %c0_i32_356 : i32
    %c2_i32_357 = arith.constant 2 : i32
    %718 = arith.addi %717, %c2_i32_357 : i32
    %719 = arith.index_cast %718 : i32 to index
    %720 = memref.load %arg1[%719] : memref<128xi32, #tpu.memory_space<smem>>
    %721 = arith.index_cast %720 : i32 to index
    %c0_358 = arith.constant 0 : index
    %722 = vector.load %arg2[%721, %c0_358] : memref<128x128xf32, #tpu.memory_space<vmem>>, vector<1x128xf32>
    %c0_i32_359 = arith.constant 0 : i32
    %723 = arith.addi %704, %c0_i32_359 : i32
    %c3_i32_360 = arith.constant 3 : i32
    %724 = arith.addi %723, %c3_i32_360 : i32
    %725 = arith.index_cast %724 : i32 to index
    %726 = memref.load %arg1[%725] : memref<128xi32, #tpu.memory_space<smem>>
    %727 = arith.index_cast %726 : i32 to index
    %c0_361 = arith.constant 0 : index
    %728 = vector.load %arg2[%727, %c0_361] : memref<128x128xf32, #tpu.memory_space<vmem>>, vector<1x128xf32>
    %c0_i32_362 = arith.constant 0 : i32
    %729 = arith.addi %704, %c0_i32_362 : i32
    %c4_i32_363 = arith.constant 4 : i32
    %730 = arith.addi %729, %c4_i32_363 : i32
    %731 = arith.index_cast %730 : i32 to index
    %732 = memref.load %arg1[%731] : memref<128xi32, #tpu.memory_space<smem>>
    %733 = arith.index_cast %732 : i32 to index
    %c0_364 = arith.constant 0 : index
    %734 = vector.load %arg2[%733, %c0_364] : memref<128x128xf32, #tpu.memory_space<vmem>>, vector<1x128xf32>
    %c0_i32_365 = arith.constant 0 : i32
    %735 = arith.addi %704, %c0_i32_365 : i32
    %c5_i32_366 = arith.constant 5 : i32
    %736 = arith.addi %735, %c5_i32_366 : i32
    %737 = arith.index_cast %736 : i32 to index
    %738 = memref.load %arg1[%737] : memref<128xi32, #tpu.memory_space<smem>>
    %739 = arith.index_cast %738 : i32 to index
    %c0_367 = arith.constant 0 : index
    %740 = vector.load %arg2[%739, %c0_367] : memref<128x128xf32, #tpu.memory_space<vmem>>, vector<1x128xf32>
    %c0_i32_368 = arith.constant 0 : i32
    %741 = arith.addi %704, %c0_i32_368 : i32
    %c6_i32_369 = arith.constant 6 : i32
    %742 = arith.addi %741, %c6_i32_369 : i32
    %743 = arith.index_cast %742 : i32 to index
    %744 = memref.load %arg1[%743] : memref<128xi32, #tpu.memory_space<smem>>
    %745 = arith.index_cast %744 : i32 to index
    %c0_370 = arith.constant 0 : index
    %746 = vector.load %arg2[%745, %c0_370] : memref<128x128xf32, #tpu.memory_space<vmem>>, vector<1x128xf32>
    %c0_i32_371 = arith.constant 0 : i32
    %747 = arith.addi %704, %c0_i32_371 : i32
    %c7_i32_372 = arith.constant 7 : i32
    %748 = arith.addi %747, %c7_i32_372 : i32
    %749 = arith.index_cast %748 : i32 to index
    %750 = memref.load %arg1[%749] : memref<128xi32, #tpu.memory_space<smem>>
    %751 = arith.index_cast %750 : i32 to index
    %c0_373 = arith.constant 0 : index
    %752 = vector.load %arg2[%751, %c0_373] : memref<128x128xf32, #tpu.memory_space<vmem>>, vector<1x128xf32>
    %753 = tpu.concatenate %710, %716, %722, %728, %734, %740, %746, %752 in 0 : vector<1x128xf32>, vector<1x128xf32>, vector<1x128xf32>, vector<1x128xf32>, vector<1x128xf32>, vector<1x128xf32>, vector<1x128xf32>, vector<1x128xf32> -> vector<8x128xf32>
    %cst_374 = arith.constant dense<0.000000e+00> : vector<128xf32>
    %754 = vector.multi_reduction <add>, %753, %cst_374 [0] : vector<8x128xf32> to vector<128xf32>
    %755 = vector.shape_cast %754 : vector<128xf32> to vector<1x128xf32>
    %c16_i32_375 = arith.constant 16 : i32
    %756 = arith.muli %arg0, %c16_i32_375 : i32
    %c14_i32 = arith.constant 14 : i32
    %757 = arith.addi %756, %c14_i32 : i32
    %c8_i32_376 = arith.constant 8 : i32
    %758 = arith.muli %757, %c8_i32_376 : i32
    %c0_i32_377 = arith.constant 0 : i32
    %759 = arith.addi %758, %c0_i32_377 : i32
    %c0_i32_378 = arith.constant 0 : i32
    %760 = arith.addi %759, %c0_i32_378 : i32
    %761 = arith.index_cast %760 : i32 to index
    %762 = memref.load %arg1[%761] : memref<128xi32, #tpu.memory_space<smem>>
    %763 = arith.index_cast %762 : i32 to index
    %c0_379 = arith.constant 0 : index
    %764 = vector.load %arg2[%763, %c0_379] : memref<128x128xf32, #tpu.memory_space<vmem>>, vector<1x128xf32>
    %c0_i32_380 = arith.constant 0 : i32
    %765 = arith.addi %758, %c0_i32_380 : i32
    %c1_i32_381 = arith.constant 1 : i32
    %766 = arith.addi %765, %c1_i32_381 : i32
    %767 = arith.index_cast %766 : i32 to index
    %768 = memref.load %arg1[%767] : memref<128xi32, #tpu.memory_space<smem>>
    %769 = arith.index_cast %768 : i32 to index
    %c0_382 = arith.constant 0 : index
    %770 = vector.load %arg2[%769, %c0_382] : memref<128x128xf32, #tpu.memory_space<vmem>>, vector<1x128xf32>
    %c0_i32_383 = arith.constant 0 : i32
    %771 = arith.addi %758, %c0_i32_383 : i32
    %c2_i32_384 = arith.constant 2 : i32
    %772 = arith.addi %771, %c2_i32_384 : i32
    %773 = arith.index_cast %772 : i32 to index
    %774 = memref.load %arg1[%773] : memref<128xi32, #tpu.memory_space<smem>>
    %775 = arith.index_cast %774 : i32 to index
    %c0_385 = arith.constant 0 : index
    %776 = vector.load %arg2[%775, %c0_385] : memref<128x128xf32, #tpu.memory_space<vmem>>, vector<1x128xf32>
    %c0_i32_386 = arith.constant 0 : i32
    %777 = arith.addi %758, %c0_i32_386 : i32
    %c3_i32_387 = arith.constant 3 : i32
    %778 = arith.addi %777, %c3_i32_387 : i32
    %779 = arith.index_cast %778 : i32 to index
    %780 = memref.load %arg1[%779] : memref<128xi32, #tpu.memory_space<smem>>
    %781 = arith.index_cast %780 : i32 to index
    %c0_388 = arith.constant 0 : index
    %782 = vector.load %arg2[%781, %c0_388] : memref<128x128xf32, #tpu.memory_space<vmem>>, vector<1x128xf32>
    %c0_i32_389 = arith.constant 0 : i32
    %783 = arith.addi %758, %c0_i32_389 : i32
    %c4_i32_390 = arith.constant 4 : i32
    %784 = arith.addi %783, %c4_i32_390 : i32
    %785 = arith.index_cast %784 : i32 to index
    %786 = memref.load %arg1[%785] : memref<128xi32, #tpu.memory_space<smem>>
    %787 = arith.index_cast %786 : i32 to index
    %c0_391 = arith.constant 0 : index
    %788 = vector.load %arg2[%787, %c0_391] : memref<128x128xf32, #tpu.memory_space<vmem>>, vector<1x128xf32>
    %c0_i32_392 = arith.constant 0 : i32
    %789 = arith.addi %758, %c0_i32_392 : i32
    %c5_i32_393 = arith.constant 5 : i32
    %790 = arith.addi %789, %c5_i32_393 : i32
    %791 = arith.index_cast %790 : i32 to index
    %792 = memref.load %arg1[%791] : memref<128xi32, #tpu.memory_space<smem>>
    %793 = arith.index_cast %792 : i32 to index
    %c0_394 = arith.constant 0 : index
    %794 = vector.load %arg2[%793, %c0_394] : memref<128x128xf32, #tpu.memory_space<vmem>>, vector<1x128xf32>
    %c0_i32_395 = arith.constant 0 : i32
    %795 = arith.addi %758, %c0_i32_395 : i32
    %c6_i32_396 = arith.constant 6 : i32
    %796 = arith.addi %795, %c6_i32_396 : i32
    %797 = arith.index_cast %796 : i32 to index
    %798 = memref.load %arg1[%797] : memref<128xi32, #tpu.memory_space<smem>>
    %799 = arith.index_cast %798 : i32 to index
    %c0_397 = arith.constant 0 : index
    %800 = vector.load %arg2[%799, %c0_397] : memref<128x128xf32, #tpu.memory_space<vmem>>, vector<1x128xf32>
    %c0_i32_398 = arith.constant 0 : i32
    %801 = arith.addi %758, %c0_i32_398 : i32
    %c7_i32_399 = arith.constant 7 : i32
    %802 = arith.addi %801, %c7_i32_399 : i32
    %803 = arith.index_cast %802 : i32 to index
    %804 = memref.load %arg1[%803] : memref<128xi32, #tpu.memory_space<smem>>
    %805 = arith.index_cast %804 : i32 to index
    %c0_400 = arith.constant 0 : index
    %806 = vector.load %arg2[%805, %c0_400] : memref<128x128xf32, #tpu.memory_space<vmem>>, vector<1x128xf32>
    %807 = tpu.concatenate %764, %770, %776, %782, %788, %794, %800, %806 in 0 : vector<1x128xf32>, vector<1x128xf32>, vector<1x128xf32>, vector<1x128xf32>, vector<1x128xf32>, vector<1x128xf32>, vector<1x128xf32>, vector<1x128xf32> -> vector<8x128xf32>
    %cst_401 = arith.constant dense<0.000000e+00> : vector<128xf32>
    %808 = vector.multi_reduction <add>, %807, %cst_401 [0] : vector<8x128xf32> to vector<128xf32>
    %809 = vector.shape_cast %808 : vector<128xf32> to vector<1x128xf32>
    %c16_i32_402 = arith.constant 16 : i32
    %810 = arith.muli %arg0, %c16_i32_402 : i32
    %c15_i32 = arith.constant 15 : i32
    %811 = arith.addi %810, %c15_i32 : i32
    %c8_i32_403 = arith.constant 8 : i32
    %812 = arith.muli %811, %c8_i32_403 : i32
    %c0_i32_404 = arith.constant 0 : i32
    %813 = arith.addi %812, %c0_i32_404 : i32
    %c0_i32_405 = arith.constant 0 : i32
    %814 = arith.addi %813, %c0_i32_405 : i32
    %815 = arith.index_cast %814 : i32 to index
    %816 = memref.load %arg1[%815] : memref<128xi32, #tpu.memory_space<smem>>
    %817 = arith.index_cast %816 : i32 to index
    %c0_406 = arith.constant 0 : index
    %818 = vector.load %arg2[%817, %c0_406] : memref<128x128xf32, #tpu.memory_space<vmem>>, vector<1x128xf32>
    %c0_i32_407 = arith.constant 0 : i32
    %819 = arith.addi %812, %c0_i32_407 : i32
    %c1_i32_408 = arith.constant 1 : i32
    %820 = arith.addi %819, %c1_i32_408 : i32
    %821 = arith.index_cast %820 : i32 to index
    %822 = memref.load %arg1[%821] : memref<128xi32, #tpu.memory_space<smem>>
    %823 = arith.index_cast %822 : i32 to index
    %c0_409 = arith.constant 0 : index
    %824 = vector.load %arg2[%823, %c0_409] : memref<128x128xf32, #tpu.memory_space<vmem>>, vector<1x128xf32>
    %c0_i32_410 = arith.constant 0 : i32
    %825 = arith.addi %812, %c0_i32_410 : i32
    %c2_i32_411 = arith.constant 2 : i32
    %826 = arith.addi %825, %c2_i32_411 : i32
    %827 = arith.index_cast %826 : i32 to index
    %828 = memref.load %arg1[%827] : memref<128xi32, #tpu.memory_space<smem>>
    %829 = arith.index_cast %828 : i32 to index
    %c0_412 = arith.constant 0 : index
    %830 = vector.load %arg2[%829, %c0_412] : memref<128x128xf32, #tpu.memory_space<vmem>>, vector<1x128xf32>
    %c0_i32_413 = arith.constant 0 : i32
    %831 = arith.addi %812, %c0_i32_413 : i32
    %c3_i32_414 = arith.constant 3 : i32
    %832 = arith.addi %831, %c3_i32_414 : i32
    %833 = arith.index_cast %832 : i32 to index
    %834 = memref.load %arg1[%833] : memref<128xi32, #tpu.memory_space<smem>>
    %835 = arith.index_cast %834 : i32 to index
    %c0_415 = arith.constant 0 : index
    %836 = vector.load %arg2[%835, %c0_415] : memref<128x128xf32, #tpu.memory_space<vmem>>, vector<1x128xf32>
    %c0_i32_416 = arith.constant 0 : i32
    %837 = arith.addi %812, %c0_i32_416 : i32
    %c4_i32_417 = arith.constant 4 : i32
    %838 = arith.addi %837, %c4_i32_417 : i32
    %839 = arith.index_cast %838 : i32 to index
    %840 = memref.load %arg1[%839] : memref<128xi32, #tpu.memory_space<smem>>
    %841 = arith.index_cast %840 : i32 to index
    %c0_418 = arith.constant 0 : index
    %842 = vector.load %arg2[%841, %c0_418] : memref<128x128xf32, #tpu.memory_space<vmem>>, vector<1x128xf32>
    %c0_i32_419 = arith.constant 0 : i32
    %843 = arith.addi %812, %c0_i32_419 : i32
    %c5_i32_420 = arith.constant 5 : i32
    %844 = arith.addi %843, %c5_i32_420 : i32
    %845 = arith.index_cast %844 : i32 to index
    %846 = memref.load %arg1[%845] : memref<128xi32, #tpu.memory_space<smem>>
    %847 = arith.index_cast %846 : i32 to index
    %c0_421 = arith.constant 0 : index
    %848 = vector.load %arg2[%847, %c0_421] : memref<128x128xf32, #tpu.memory_space<vmem>>, vector<1x128xf32>
    %c0_i32_422 = arith.constant 0 : i32
    %849 = arith.addi %812, %c0_i32_422 : i32
    %c6_i32_423 = arith.constant 6 : i32
    %850 = arith.addi %849, %c6_i32_423 : i32
    %851 = arith.index_cast %850 : i32 to index
    %852 = memref.load %arg1[%851] : memref<128xi32, #tpu.memory_space<smem>>
    %853 = arith.index_cast %852 : i32 to index
    %c0_424 = arith.constant 0 : index
    %854 = vector.load %arg2[%853, %c0_424] : memref<128x128xf32, #tpu.memory_space<vmem>>, vector<1x128xf32>
    %c0_i32_425 = arith.constant 0 : i32
    %855 = arith.addi %812, %c0_i32_425 : i32
    %c7_i32_426 = arith.constant 7 : i32
    %856 = arith.addi %855, %c7_i32_426 : i32
    %857 = arith.index_cast %856 : i32 to index
    %858 = memref.load %arg1[%857] : memref<128xi32, #tpu.memory_space<smem>>
    %859 = arith.index_cast %858 : i32 to index
    %c0_427 = arith.constant 0 : index
    %860 = vector.load %arg2[%859, %c0_427] : memref<128x128xf32, #tpu.memory_space<vmem>>, vector<1x128xf32>
    %861 = tpu.concatenate %818, %824, %830, %836, %842, %848, %854, %860 in 0 : vector<1x128xf32>, vector<1x128xf32>, vector<1x128xf32>, vector<1x128xf32>, vector<1x128xf32>, vector<1x128xf32>, vector<1x128xf32>, vector<1x128xf32> -> vector<8x128xf32>
    %cst_428 = arith.constant dense<0.000000e+00> : vector<128xf32>
    %862 = vector.multi_reduction <add>, %861, %cst_428 [0] : vector<8x128xf32> to vector<128xf32>
    %863 = vector.shape_cast %862 : vector<128xf32> to vector<1x128xf32>
    %864 = tpu.concatenate %53, %107, %161, %215, %269, %323, %377, %431, %485, %539, %593, %647, %701, %755, %809, %863 in 0 : vector<1x128xf32>, vector<1x128xf32>, vector<1x128xf32>, vector<1x128xf32>, vector<1x128xf32>, vector<1x128xf32>, vector<1x128xf32>, vector<1x128xf32>, vector<1x128xf32>, vector<1x128xf32>, vector<1x128xf32>, vector<1x128xf32>, vector<1x128xf32>, vector<1x128xf32>, vector<1x128xf32>, vector<1x128xf32> -> vector<16x128xf32>
    %c0_429 = arith.constant 0 : index
    %c0_430 = arith.constant 0 : index
    %865 = vector.load %arg3[%c0_429, %c0_430] : memref<128x128xf32, #tpu.memory_space<vmem>>, vector<128x128xf32>
    %cst_431 = arith.constant dense<0.000000e+00> : vector<16x128xf32>
    %866 = tpu.matmul %864, %865, %cst_431 {dimension_numbers = #tpu.dot_dimension_numbers<[1], [0], [0], [1], [0, 0, 1, 1], [], []>} : vector<16x128xf32>, vector<128x128xf32>, vector<16x128xf32> -> vector<16x128xf32>
    %c0_432 = arith.constant 0 : index
    %c0_433 = arith.constant 0 : index
    %867 = vector.load %arg4[%c0_432, %c0_433] : memref<1x128xf32, #tpu.memory_space<vmem>>, vector<1x128xf32>
    %868 = vector.broadcast %867 : vector<1x128xf32> to vector<16x128xf32>
    %869 = arith.addf %866, %868 : vector<16x128xf32>
    %cst_434 = arith.constant dense<0xFF800000> : vector<16xf32>
    %870 = vector.multi_reduction <maximumf>, %869, %cst_434 [1] : vector<16x128xf32> to vector<16xf32>
    %871 = vector.shape_cast %870 : vector<16xf32> to vector<16x1xf32>
    %872 = vector.broadcast %871 : vector<16x1xf32> to vector<16x128xf32>
    %873 = arith.subf %869, %872 : vector<16x128xf32>
    %874 = math.exp %873 : vector<16x128xf32>
    %cst_435 = arith.constant dense<0.000000e+00> : vector<16xf32>
    %875 = vector.multi_reduction <add>, %874, %cst_435 [1] : vector<16x128xf32> to vector<16xf32>
    %876 = vector.shape_cast %875 : vector<16xf32> to vector<16x1xf32>
    %877 = math.log %876 : vector<16x1xf32>
    %878 = vector.broadcast %877 : vector<16x1xf32> to vector<16x128xf32>
    %879 = arith.subf %873, %878 : vector<16x128xf32>
    %c0_436 = arith.constant 0 : index
    %c0_437 = arith.constant 0 : index
    %880 = vector.load %arg5[%c0_436, %c0_437] : memref<16x128xf32, #tpu.memory_space<vmem>>, vector<16x128xf32>
    tpu.vector_store %arg5[%c0_436, %c0_437], %879 {strides = array<i32>} : memref<16x128xf32, #tpu.memory_space<vmem>>, vector<16x128xf32>,
    return
  }
  func.func @transform_0(%arg0: i32, %arg1: memref<128xi32, #tpu.memory_space<smem>>) -> (i32, i32) {
    %c0_i32 = arith.constant 0 : i32
    %c0_i32_0 = arith.constant 0 : i32
    %c0_i32_1 = arith.constant 0 : i32
    return %c0_i32, %c0_i32_0 : i32, i32
  }
  func.func @transform_1(%arg0: i32, %arg1: memref<128xi32, #tpu.memory_space<smem>>) -> (i32, i32) {
    %c0_i32 = arith.constant 0 : i32
    %c0_i32_0 = arith.constant 0 : i32
    %c0_i32_1 = arith.constant 0 : i32
    return %c0_i32, %c0_i32_0 : i32, i32
  }
  func.func @transform_2(%arg0: i32, %arg1: memref<128xi32, #tpu.memory_space<smem>>) -> (i32, i32) {
    %c0_i32 = arith.constant 0 : i32
    %c0_i32_0 = arith.constant 0 : i32
    %c0_i32_1 = arith.constant 0 : i32
    return %c0_i32, %c0_i32_0 : i32, i32
  }
  func.func @transform_3(%arg0: i32, %arg1: memref<128xi32, #tpu.memory_space<smem>>) -> (i32, i32) {
    %c0_i32 = arith.constant 0 : i32
    %c0_i32_0 = arith.constant 0 : i32
    return %arg0, %c0_i32 : i32, i32
  }
}

</mosaic_0001>

<bundles_post_ra>
// kernel: tpu_custom_call.1
= control target key start
LH: loop header
LB: loop body
LE: loop exit
PB: predicated region body
PF: predicated region fallthrough
CT: control target
= control target key end

     0   :  { %s1612_s18 = smov [#allocation3]   ;;  %s2203_s0 = inlined_call_operand.hbm [shape: s32[128], index: 0, kind: input, shape index: {}]   ;;  %s2204_s1 = inlined_call_operand.hbm [shape: f32[128,128], index: 1, kind: input, shape index: {}]   ;;  %s2205_s2 = inlined_call_operand.hbm [shape: f32[128,128], index: 2, kind: input, shape index: {}]   ;;  %s2206_s3 = inlined_call_operand.vmem [shape: f32[1,128], index: 3, kind: input, shape index: {}]   ;;  %s2207_s4 = inlined_call_operand.hbm [shape: f32[16,128], index: 4, kind: output, shape index: {}]  }
   0x1   :  { %s10_s17 = sshll.u32 %s2203_s0, 4  ;;  %s11_s17 = int_to_ptr.hbm [resolvable:$true] %s10_s17 }
   0x2   :  { %13 = dma.hbm_to_smem %s11_s17, 16, %s1612_s18, [#allocation2] }
   0x3   :  { %1604 = dma.done.wait [#allocation2], 16 }
   0x4   :  { %1605 = vsyncadd [#allocation2], 4294967280 }
   0x5   :  { %16 = sfence }
   0x6   :  { %17 = vsyncpa [#allocation5], 0 }
   0x7   :  { %18 = vsyncpa [#allocation8], 0 }
   0x8   :  { %19 = vsyncpa [#allocation6], 0  ;;  %s24_s21 = sshll.u32 %s2204_s1, 4  ;;  %s1613_s22 = smov [#allocation4]   ;;  %s25_s21 = int_to_ptr.hbm [resolvable:$true] %s24_s21 }
   0x9   :  { %s26_s23 = sshll.u32 %s1613_s22, 4  ;;  %s37_s0 = sshll.u32 %s2205_s2, 4  ;;  %s27_s23 = int_to_ptr.vmem [resolvable:$true] %s26_s23  ;;  %s38_s0 = int_to_ptr.hbm [resolvable:$true] %s37_s0 }
   0xa   :  { %s1614_s26 = smov 128   ;;  %s1615_s27 = smov 8  }
   0xb   :  { %32 = dma.hbm_to_vmem [thread:$0]  %s25_s21, 2048, %s27_s23, [#allocation5], %s1614_s26, %s1614_s26, %s1615_s27  }
   0xc   :  { %s1616_s28 = smov [#allocation7]  }
   0xd   :  { %s39_s29 = sshll.u32 %s1616_s28, 4  ;;  %s40_s29 = int_to_ptr.vmem [resolvable:$true] %s39_s29 }
   0xe   :  { %45 = dma.hbm_to_vmem [thread:$0]  %s38_s0, 2048, %s40_s29, [#allocation8], %s1614_s26, %s1614_s26, %s1615_s27  }
   0xf   :  { %1606 = dma.done.wait [#allocation5], 2048  }
  0x10   :  { %1607 = vsyncadd [#allocation5], 4294965248 }
  0x11   :  { %1608 = dma.done.wait [#allocation8], 2048  }
  0x12   :  { %1609 = vsyncadd [#allocation8], 4294965248  ;;  %s1362_s1 = sld [smem:[#allocation3 + $0x1]]  ;;  %v1164_v0 = vld [vmem:[#allocation7 + $0x78] sm:$0xff]  ;;  %v1163_v1 = vld [vmem:[#allocation7 + $0x70] sm:$0xff]  ;;  %vm109_vm0 = vcmask 1040384  }
  0x13   :  { %s1658_s2 = sld [smem:[#allocation3]]  ;;  %1169 = vmatpush.msra.mxu0 %v1164_v0  ;;  %1489 = vmatpush.msra.mxu1 %v1164_v0  ;;  %v1162_v2 = vld [vmem:[#allocation7 + $0x68] sm:$0xff]  ;;  %v1161_v3 = vld [vmem:[#allocation7 + $0x60] sm:$0xff]  ;;  %v1160_v4 = vld [vmem:[#allocation7 + $0x58] sm:$0xff]  ;;  %vm111_vm1 = vcmask 1041408   ;;  %vm113_vm2 = vcmask 1042432  }
  0x14   :  { %s1660_s30 = sld [smem:[#allocation3 + $0x2]]  ;;  %v1159_v5 = vld [vmem:[#allocation7 + $0x50] sm:$0xff]  ;;  %v1158_v6 = vld [vmem:[#allocation7 + $0x48] sm:$0xff]  ;;  %v1157_v9 = vld [vmem:[#allocation7 + $0x40] sm:$0xff]  ;;  %vm115_vm3 = vcmask 1043456   ;;  %vm117_vm4 = vcmask 1044480  }
  0x15   :  { %s1662_s5 = sld [smem:[#allocation3 + $0x8]]  ;;  %1170 = vmatpush.msra.mxu0 %v1163_v1  ;;  %1490 = vmatpush.msra.mxu1 %v1163_v1  ;;  %v1156_v12 = vld [vmem:[#allocation7 + $0x38] sm:$0xff]  ;;  %v1155_v16 = vld [vmem:[#allocation7 + $0x30] sm:$0xff]  ;;  %v1154_v20 = vld [vmem:[#allocation7 + $0x28] sm:$0xff]  ;;  %vm119_vm5 = vcmask 1045504   ;;  %vm121_vm6 = vcmask 1046528  }
  0x16   :  { %s1370_s6 = sld [smem:[#allocation3 + $0x9]]  ;;  %v1153_v23 = vld [vmem:[#allocation7 + $0x20] sm:$0xff]  ;;  %v1152_v31 = vld [vmem:[#allocation7 + $0x18] sm:$0xff]  ;;  %v1151_v38 = vld [vmem:[#allocation7 + $0x10] sm:$0xff] }
  0x17   :  { %s1664_s7 = sld [smem:[#allocation3 + $0xa]]  ;;  %1171 = vmatpush.msra.mxu0 %v1162_v2  ;;  %1491 = vmatpush.msra.mxu1 %v1162_v2  ;;  %v1150_v39 = vld [vmem:[#allocation7 + $0x8] sm:$0xff]  ;;  %v1149_v47 = vld [vmem:[#allocation7] sm:$0xff] }
  0x18   :  { %s1666_s8 = sld [smem:[#allocation3 + $0x3]]  ;;  %s62_s12 = scalar_lea.vmem [#allocation4], %s1362_s1 }
  0x19   :  { %1172 = vmatpush.msra.mxu0 %v1161_v3  ;;  %1492 = vmatpush.msra.mxu1 %v1161_v3  ;;  %s1668_s9 = sld [smem:[#allocation3 + $0x4]]  ;;  %v63_v7 = vld [vmem:[%s62_s12] sm:$0x1]  ;;  %s58_s19 = scalar_lea.vmem [#allocation4], %s1658_s2 }
  0x1a   :  { %s1670_s10 = sld [smem:[#allocation3 + $0x5]]  ;;  %s66_s17 = scalar_lea.vmem [#allocation4], %s1660_s30  ;;  %v89_v11 = vrot.slane %v63_v7, 7  ;;  %v59_v13 = vld [vmem:[%s58_s19] sm:$0x1] }
  0x1b   :  { %1173 = vmatpush.msra.mxu0 %v1160_v4  ;;  %1493 = vmatpush.msra.mxu1 %v1160_v4  ;;  %s1672_s11 = sld [smem:[#allocation3 + $0x6]]  ;;  %v67_v10 = vld [vmem:[%s66_s17] sm:$0x1]  ;;  %s133_s21 = scalar_lea.vmem [#allocation4], %s1662_s5 }
  0x1c   :  { %s1674_s13 = sld [smem:[#allocation3 + $0x7]]  ;;  %s137_s14 = scalar_lea.vmem [#allocation4], %s1370_s6  ;;  %v134_v17 = vld [vmem:[%s133_s21] sm:$0x1]  ;;  %v92_v19 = vrot.slane %v67_v10, 6  ;;  %v110_v21 = vsel %vm109_vm0, %v59_v13, %v89_v11 }
  0x1d   :  { %1174 = vmatpush.msra.mxu0 %v1159_v5  ;;  %1494 = vmatpush.msra.mxu1 %v1159_v5  ;;  %v138_v8 = vld [vmem:[%s137_s14] sm:$0x1]  ;;  %s1676_s15 = sld [smem:[#allocation3 + $0xb]]  ;;  %s141_s20 = scalar_lea.vmem [#allocation4], %s1664_s7 }
  0x1e   :  { %s1678_s16 = sld [smem:[#allocation3 + $0xc]]  ;;  %v142_v14 = vld [vmem:[%s141_s20] sm:$0x1]  ;;  %v164_v15 = vrot.slane %v138_v8, 7  ;;  %s70_s23 = scalar_lea.vmem [#allocation4], %s1666_s8  ;;  %v112_v28 = vsel %vm111_vm1, %v110_v21, %v92_v19 }
  0x1f   :  { %1175 = vmatpush.msra.mxu0 %v1158_v6  ;;  %1495 = vmatpush.msra.mxu1 %v1158_v6  ;;  %s1681_s18 = sld [smem:[#allocation3 + $0xd]]  ;;  %v71_v18 = vld [vmem:[%s70_s23] sm:$0x1]  ;;  %v167_v22 = vrot.slane %v142_v14, 6  ;;  %s74_s29 = scalar_lea.vmem [#allocation4], %s1668_s9 }
  0x20   :  { %s1686_s22 = sld [smem:[#allocation3 + $0xe]]  ;;  %v184_v25 = vsel %vm109_vm0, %v134_v17, %v164_v15  ;;  %v75_v26 = vld [vmem:[%s74_s29] sm:$0x1]  ;;  %v95_v27 = vrot.slane %v71_v18, 5  ;;  %s78_s5 = scalar_lea.vmem [#allocation4], %s1670_s10 }
  0x21   :  { %1176 = vmatpush.msra.mxu0 %v1157_v9  ;;  %1496 = vmatpush.msra.mxu1 %v1157_v9  ;;  %s1689_s24 = sld [smem:[#allocation3 + $0xf]]  ;;  %v185_v32 = vsel %vm111_vm1, %v184_v25, %v167_v22  ;;  %v79_v33 = vld [vmem:[%s78_s5] sm:$0x1]  ;;  %v98_v34 = vrot.slane %v75_v26, 4  ;;  %s82_s10 = scalar_lea.vmem [#allocation4], %s1672_s11 }
  0x22   :  { %s1692_s25 = sld [smem:[#allocation3 + $0x11]]  ;;  %v114_v35 = vsel %vm113_vm2, %v112_v28, %v95_v27  ;;  %v83_v41 = vld [vmem:[%s82_s10] sm:$0x1]  ;;  %v101_v42 = vrot.slane %v79_v33, 3  ;;  %s86_s14 = scalar_lea.vmem [#allocation4], %s1674_s13 }
  0x23   :  { %1177 = vmatpush.msra.mxu0 %v1156_v12  ;;  %1497 = vmatpush.msra.mxu1 %v1156_v12  ;;  %s145_s0 = scalar_lea.vmem [#allocation4], %s1676_s15  ;;  %s1696_s28 = sld [smem:[#allocation3 + $0x10]]  ;;  %v87_v43 = vld [vmem:[%s86_s14] sm:$0x1]  ;;  %v116_v44 = vsel %vm115_vm3, %v114_v35, %v98_v34  ;;  %v104_v50 = vrot.slane %v83_v41, 2 }
  0x24   :  { %v146_v24 = vld [vmem:[%s145_s0] sm:$0x1]  ;;  %s1699_s1 = sld [smem:[#allocation3 + $0x12]]  ;;  %s149_s2 = scalar_lea.vmem [#allocation4], %s1678_s16  ;;  %v118_v52 = vsel %vm117_vm4, %v116_v44, %v101_v42  ;;  %v107_v58 = vrot.slane %v87_v43, 1 }
  0x25   :  { %1178 = vmatpush.msra.mxu0 %v1155_v16  ;;  %1498 = vmatpush.msra.mxu1 %v1155_v16  ;;  %v150_v29 = vld [vmem:[%s149_s2] sm:$0x1]  ;;  %v170_v30 = vrot.slane %v146_v24, 5  ;;  %s1703_s30 = sld [smem:[#allocation3 + $0x13]]  ;;  %s153_s7 = scalar_lea.vmem [#allocation4], %s1681_s18  ;;  %v120_v60 = vsel %vm119_vm5, %v118_v52, %v104_v50 }
  0x26   :  { %s1707_s6 = sld [smem:[#allocation3 + $0x14]]  ;;  %v154_v36 = vld [vmem:[%s153_s7] sm:$0x1]  ;;  %v173_v37 = vrot.slane %v150_v29, 4  ;;  %s157_s15 = scalar_lea.vmem [#allocation4], %s1686_s22  ;;  %v122_v5 = vsel %vm121_vm6, %v120_v60, %v107_v58 }
  0x27   :  { %1179 = vmatpush.msra.mxu0 %v1154_v20  ;;  %1499 = vmatpush.msra.mxu1 %v1154_v20  ;;  %s1711_s8 = sld [smem:[#allocation3 + $0x15]]  ;;  %v186_v40 = vsel %vm113_vm2, %v185_v32, %v170_v30  ;;  %v158_v45 = vld [vmem:[%s157_s15] sm:$0x1]  ;;  %v176_v46 = vrot.slane %v154_v36, 3  ;;  %s161_s13 = scalar_lea.vmem [#allocation4], %s1689_s24  ;;  %v123_v15 = vrot.slane %v122_v5, 4 }
  0x28   :  { %s1714_s9 = sld [smem:[#allocation3 + $0x16]]  ;;  %v187_v48 = vsel %vm115_vm3, %v186_v40, %v173_v37  ;;  %s204_s11 = scalar_lea.vmem [#allocation4], %s1692_s25  ;;  %v162_v51 = vld [vmem:[%s161_s13] sm:$0x1]  ;;  %v179_v53 = vrot.slane %v158_v45, 2 }
  0x29   :  { %1180 = vmatpush.msra.mxu0 %v1153_v23  ;;  %1500 = vmatpush.msra.mxu1 %v1153_v23  ;;  %s1717_s12 = sld [smem:[#allocation3 + $0x18]]  ;;  %v205_v49 = vld [vmem:[%s204_s11] sm:$0x1]  ;;  %s200_s19 = scalar_lea.vmem [#allocation4], %s1696_s28  ;;  %v188_v55 = vsel %vm117_vm4, %v187_v48, %v176_v46  ;;  %v182_v61 = vrot.slane %v162_v51, 1  ;;  %v1775_v25 = vadd.f32 %v123_v15, %v122_v5 }
  0x2a   :  { %s1722_s16 = sld [smem:[#allocation3 + $0x19]]  ;;  %v201_v54 = vld [vmem:[%s200_s19] sm:$0x1]  ;;  %s208_s21 = scalar_lea.vmem [#allocation4], %s1699_s1  ;;  %v231_v57 = vrot.slane %v205_v49, 7  ;;  %v189_v63 = vsel %vm119_vm5, %v188_v55, %v179_v53 }
  0x2b   :  { %1181 = vmatpush.msra.mxu0 %v1152_v31  ;;  %1501 = vmatpush.msra.mxu1 %v1152_v31  ;;  %s1726_s17 = sld [smem:[#allocation3 + $0x1a]]  ;;  %v209_v56 = vld [vmem:[%s208_s21] sm:$0x1]  ;;  %s212_s23 = scalar_lea.vmem [#allocation4], %s1703_s30  ;;  %v190_v8 = vsel %vm121_vm6, %v189_v63, %v182_v61 }
  0x2c   :  { %s1729_s18 = sld [smem:[#allocation3 + $0x1b]]  ;;  %v213_v59 = vld [vmem:[%s212_s23] sm:$0x1]  ;;  %v234_v0 = vrot.slane %v209_v56, 6  ;;  %v251_v2 = vsel %vm109_vm0, %v201_v54, %v231_v57  ;;  %s216_s30 = scalar_lea.vmem [#allocation4], %s1707_s6  ;;  %v191_v17 = vrot.slane %v190_v8, 4 }
  0x2d   :  { %1182 = vmatpush.msra.mxu0 %v1151_v38  ;;  %1502 = vmatpush.msra.mxu1 %v1151_v38  ;;  %s1733_s20 = sld [smem:[#allocation3 + $0x1c]]  ;;  %v217_v9 = vld [vmem:[%s216_s30] sm:$0x1]  ;;  %v237_v10 = vrot.slane %v213_v59, 5  ;;  %s220_s6 = scalar_lea.vmem [#allocation4], %s1711_s8 }
  0x2e   :  { %s1737_s22 = sld [smem:[#allocation3 + $0x17]]  ;;  %v252_v12 = vsel %vm111_vm1, %v251_v2, %v234_v0  ;;  %v221_v18 = vld [vmem:[%s220_s6] sm:$0x1]  ;;  %v240_v19 = vrot.slane %v217_v9, 4  ;;  %v1780_v28 = vadd.f32 %v191_v17, %v190_v8 }
  0x2f   :  { %1183 = vmatpush.msra.mxu0 %v1150_v39  ;;  %1503 = vmatpush.msra.mxu1 %v1150_v39  ;;  %s1740_s24 = sld [smem:[#allocation3 + $0x1d]]  ;;  %s267_s25 = scalar_lea.vmem [#allocation4], %s1717_s12  ;;  %v253_v20 = vsel %vm113_vm2, %v252_v12, %v237_v10  ;;  %v243_v26 = vrot.slane %v221_v18, 3  ;;  %v125_v39 = vrot.slane %v1775_v25, 2 }
  0x30   :  { %v268_v62 = vld [vmem:[%s267_s25] sm:$0x1]  ;;  %s1744_s0 = sld [smem:[#allocation3 + $0x1e]]  ;;  %s271_s28 = scalar_lea.vmem [#allocation4], %s1722_s16  ;;  %v254_v30 = vsel %vm115_vm3, %v253_v20, %v240_v19  ;;  %v193_v43 = vrot.slane %v1780_v28, 2 }
  0x31   :  { %1184 = vmatpush.msra.mxu0 %v1149_v47  ;;  %1504 = vmatpush.msra.mxu1 %v1149_v47  ;;  %v272_v1 = vld [vmem:[%s271_s28] sm:$0x1]  ;;  %s1748_s29 = sld [smem:[#allocation3 + $0x1f]]  ;;  %s275_s1 = scalar_lea.vmem [#allocation4], %s1726_s17  ;;  %v255_v40 = vsel %vm117_vm4, %v254_v30, %v243_v26 }
  0x32   :  { %v276_v3 = vld [vmem:[%s275_s1] sm:$0x1]  ;;  %v298_v4 = vrot.slane %v272_v1, 7  ;;  %s279_s2 = scalar_lea.vmem [#allocation4], %s1729_s18  ;;  %s1757_s5 = sld [smem:[#allocation3 + $0x20]]  ;;  %v1835_v8 = vadd.f32 %v193_v43, %v1780_v28 }
  0x33   :  { %v280_v6 = vld [vmem:[%s279_s2] sm:$0x1]  ;;  %v301_v7 = vrot.slane %v276_v3, 6  ;;  %s283_s7 = scalar_lea.vmem [#allocation4], %s1733_s20  ;;  %s1761_s10 = sld [smem:[#allocation3 + $0x21]] }
  0x34   :  { %v318_v11 = vsel %vm109_vm0, %v268_v62, %v298_v4  ;;  %v284_v13 = vld [vmem:[%s283_s7] sm:$0x1]  ;;  %v304_v14 = vrot.slane %v280_v6, 5  ;;  %s1764_s12 = sld [smem:[#allocation3 + $0x22]]  ;;  %s224_s16 = scalar_lea.vmem [#allocation4], %s1714_s9  ;;  %v1828_v4 = vadd.f32 %v125_v39, %v1775_v25 }
  0x35   :  { %v319_v16 = vsel %vm111_vm1, %v318_v11, %v301_v7  ;;  %s287_s14 = scalar_lea.vmem [#allocation4], %s1740_s24  ;;  %v307_v22 = vrot.slane %v284_v13, 4  ;;  %s1769_s15 = sld [smem:[#allocation3 + $0x23]]  ;;  %v225_v23 = vld [vmem:[%s224_s16] sm:$0x1] }
  0x36   :  { %v288_v21 = vld [vmem:[%s287_s14] sm:$0x1]  ;;  %v320_v24 = vsel %vm113_vm2, %v319_v16, %v304_v14  ;;  %s1773_s11 = sld [smem:[#allocation3 + $0x24]]  ;;  %s291_s8 = scalar_lea.vmem [#allocation4], %s1744_s0  ;;  %v246_v36 = vrot.slane %v225_v23, 2  ;;  %v127_v18 = vrot.slane %v1828_v4, 1 }
  0x37   :  { %v292_v27 = vld [vmem:[%s291_s8] sm:$0x1]  ;;  %s1778_s17 = sld [smem:[#allocation3 + $0x25]]  ;;  %s228_s13 = scalar_lea.vmem [#allocation4], %s1737_s22  ;;  %v310_v32 = vrot.slane %v288_v21, 3  ;;  %v321_v34 = vsel %vm115_vm3, %v320_v24, %v307_v22  ;;  %v195_v21 = vrot.slane %v1835_v8, 1 }
  0x38   :  { %v229_v29 = vld [vmem:[%s228_s13] sm:$0x1]  ;;  %s295_s9 = scalar_lea.vmem [#allocation4], %s1748_s29  ;;  %s334_s18 = scalar_lea.vmem [#allocation4], %s1757_s5  ;;  %v313_v41 = vrot.slane %v292_v27, 2  ;;  %v256_v52 = vsel %vm119_vm5, %v255_v40, %v246_v36 }
  0x39   :  { %v296_v31 = vld [vmem:[%s295_s9] sm:$0x1]  ;;  %s1786_s19 = sld [smem:[#allocation3 + $0x26]]  ;;  %s338_s20 = scalar_lea.vmem [#allocation4], %s1761_s10  ;;  %v322_v44 = vsel %vm117_vm4, %v321_v34, %v310_v32  ;;  %v249_v47 = vrot.slane %v229_v29, 1 }
  0x3a   :  { %v335_v33 = vld [vmem:[%s334_s18] sm:$0x1]  ;;  %s1790_s21 = sld [smem:[#allocation3 + $0x27]]  ;;  %s342_s23 = scalar_lea.vmem [#allocation4], %s1764_s12  ;;  %v316_v48 = vrot.slane %v296_v31, 1  ;;  %v323_v55 = vsel %vm119_vm5, %v322_v44, %v313_v41 }
  0x3b   :  { %v339_v35 = vld [vmem:[%s338_s20] sm:$0x1]  ;;  %s1793_s22 = sld [smem:[#allocation3 + $0x28]]  ;;  %s346_s25 = scalar_lea.vmem [#allocation4], %s1769_s15  ;;  %v257_v62 = vsel %vm121_vm6, %v256_v52, %v249_v47 }
  0x3c   :  { %v343_v37 = vld [vmem:[%s342_s23] sm:$0x1]  ;;  %v365_v38 = vrot.slane %v339_v35, 7  ;;  %s1797_s24 = sld [smem:[#allocation3 + $0x29]]  ;;  %s350_s28 = scalar_lea.vmem [#allocation4], %s1773_s11  ;;  %v324_v1 = vsel %vm121_vm6, %v323_v55, %v316_v48  ;;  %v258_v9 = vrot.slane %v257_v62, 4 }
  0x3d   :  { %v368_v42 = vrot.slane %v343_v37, 6  ;;  %v347_v45 = vld [vmem:[%s346_s25] sm:$0x1]  ;;  %s1803_s0 = sld [smem:[#allocation3 + $0x2a]]  ;;  %s354_s29 = scalar_lea.vmem [#allocation4], %s1778_s17  ;;  %v325_v11 = vrot.slane %v324_v1, 4 }
  0x3e   :  { %v385_v46 = vsel %vm109_vm0, %v335_v33, %v365_v38  ;;  %v351_v49 = vld [vmem:[%s350_s28] sm:$0x1]  ;;  %v371_v50 = vrot.slane %v347_v45, 5  ;;  %s1809_s1 = sld [smem:[#allocation3 + $0x2b]]  ;;  %v259_v22 = vadd.f32 %v258_v9, %v257_v62  ;;  %v128_v62 = vadd.f32 %v127_v18, %v1828_v4 }
  0x3f   :  { %v386_v51 = vsel %vm111_vm1, %v385_v46, %v368_v42  ;;  %v355_v53 = vld [vmem:[%s354_s29] sm:$0x1]  ;;  %v374_v54 = vrot.slane %v351_v49, 4  ;;  %s358_s2 = scalar_lea.vmem [#allocation4], %s1786_s19  ;;  %s1814_s30 = sld [smem:[#allocation3 + $0x2c]]  ;;  %v326_v28 = vadd.f32 %v325_v11, %v324_v1 }
  0x40   :  { %v359_v56 = vld [vmem:[%s358_s2] sm:$0x1]  ;;  %v377_v57 = vrot.slane %v355_v53, 3  ;;  %v387_v58 = vsel %vm113_vm2, %v386_v51, %v371_v50  ;;  %s362_s5 = scalar_lea.vmem [#allocation4], %s1790_s21  ;;  %s1818_s7 = sld [smem:[#allocation3 + $0x2d]]  ;;  %v260_v34 = vrot.slane %v259_v22, 2 }
  0x41   :  { %v363_v59 = vld [vmem:[%s362_s5] sm:$0x1]  ;;  %v380_v60 = vrot.slane %v359_v56, 2  ;;  %v388_v61 = vsel %vm115_vm3, %v387_v58, %v374_v54  ;;  %s401_s10 = scalar_lea.vmem [#allocation4], %s1793_s22  ;;  %s1825_s6 = sld [smem:[#allocation3 + $0x2e]]  ;;  %v327_v40 = vrot.slane %v326_v28, 2 }
  0x42   :  { %v389_v63 = vsel %vm117_vm4, %v388_v61, %v377_v57  ;;  %v402_v0 = vld [vmem:[%s401_s10] sm:$0x1]  ;;  %v383_v2 = vrot.slane %v363_v59, 1  ;;  %s405_s12 = scalar_lea.vmem [#allocation4], %s1797_s24  ;;  %s1832_s15 = sld [smem:[#allocation3 + $0x2f]]  ;;  %v261_v51 = vadd.f32 %v260_v34, %v259_v22 }
  0x43   :  { %v406_v3 = vld [vmem:[%s405_s12] sm:$0x1]  ;;  %v390_v5 = vsel %vm119_vm5, %v389_v63, %v380_v60  ;;  %s409_s14 = scalar_lea.vmem [#allocation4], %s1803_s0  ;;  %s1837_s16 = sld [smem:[#allocation3 + $0x30]]  ;;  %v328_v63 = vadd.f32 %v327_v40, %v326_v28 }
  0x44   :  { %v410_v6 = vld [vmem:[%s409_s14] sm:$0x1]  ;;  %v432_v7 = vrot.slane %v406_v3, 7  ;;  %s413_s11 = scalar_lea.vmem [#allocation4], %s1809_s1  ;;  %s1841_s8 = sld [smem:[#allocation3 + $0x31]]  ;;  %v391_v14 = vsel %vm121_vm6, %v390_v5, %v383_v2  ;;  %v196_v3 = vadd.f32 %v195_v21, %v1835_v8  ;;  %v262_v5 = vrot.slane %v261_v51, 1 }
  0x45   :  { %v435_v10 = vrot.slane %v410_v6, 6  ;;  %v414_v12 = vld [vmem:[%s413_s11] sm:$0x1]  ;;  %s417_s17 = scalar_lea.vmem [#allocation4], %s1814_s30  ;;  %s1846_s13 = sld [smem:[#allocation3 + $0x32]]  ;;  %v392_v25 = vrot.slane %v391_v14, 4 }
  0x46   :  { %v452_v13 = vsel %vm109_vm0, %v402_v0, %v432_v7  ;;  %v418_v15 = vld [vmem:[%s417_s17] sm:$0x1]  ;;  %v438_v16 = vrot.slane %v414_v12, 5  ;;  %s421_s9 = scalar_lea.vmem [#allocation4], %s1818_s7  ;;  %s1850_s18 = sld [smem:[#allocation3 + $0x33]]  ;;  %v329_v8 = vrot.slane %v328_v63, 1  ;;  %v263_v18 = vadd.f32 %v262_v5, %v261_v51 }
  0x47   :  { %v453_v17 = vsel %vm111_vm1, %v452_v13, %v435_v10  ;;  %v422_v19 = vld [vmem:[%s421_s9] sm:$0x1]  ;;  %v441_v20 = vrot.slane %v418_v15, 4  ;;  %s1854_s19 = sld [smem:[#allocation3 + $0x34]]  ;;  %s425_s20 = scalar_lea.vmem [#allocation4], %s1825_s6  ;;  %v393_v41 = vadd.f32 %v392_v25, %v391_v14  ;;  %v1135_v21 = vsel %vm109_vm0, %v128_v62, %v196_v3 }
  0x48   :  { %v444_v23 = vrot.slane %v422_v19, 3  ;;  %v454_v24 = vsel %vm113_vm2, %v453_v17, %v438_v16  ;;  %v426_v26 = vld [vmem:[%s425_s20] sm:$0x1]  ;;  %s1858_s21 = sld [smem:[#allocation3 + $0x35]]  ;;  %s429_s23 = scalar_lea.vmem [#allocation4], %s1832_s15 }
  0x49   :  { %v455_v27 = vsel %vm115_vm3, %v454_v24, %v441_v20  ;;  %v430_v29 = vld [vmem:[%s429_s23] sm:$0x1]  ;;  %v447_v30 = vrot.slane %v426_v26, 2  ;;  %s1862_s22 = sld [smem:[#allocation3 + $0x36]]  ;;  %s468_s24 = scalar_lea.vmem [#allocation4], %s1837_s16  ;;  %v394_v55 = vrot.slane %v393_v41, 2 }
  0x4a   :  { %v456_v31 = vsel %vm117_vm4, %v455_v27, %v444_v23  ;;  %v450_v32 = vrot.slane %v430_v29, 1  ;;  %v469_v33 = vld [vmem:[%s468_s24] sm:$0x1]  ;;  %s1865_s25 = sld [smem:[#allocation3 + $0x37]]  ;;  %s472_s0 = scalar_lea.vmem [#allocation4], %s1841_s8 }
  0x4b   :  { %v457_v35 = vsel %vm119_vm5, %v456_v31, %v447_v30  ;;  %v473_v36 = vld [vmem:[%s472_s0] sm:$0x1]  ;;  %s1869_s28 = sld [smem:[#allocation3 + $0x38]]  ;;  %s476_s29 = scalar_lea.vmem [#allocation4], %s1846_s13  ;;  %v395_v7 = vadd.f32 %v394_v55, %v393_v41  ;;  %v330_v30 = vadd.f32 %v329_v8, %v328_v63 }
  0x4c   :  { %v458_v37 = vsel %vm121_vm6, %v457_v35, %v450_v32  ;;  %v477_v38 = vld [vmem:[%s476_s29] sm:$0x1]  ;;  %v499_v39 = vrot.slane %v473_v36, 7  ;;  %s1873_s1 = sld [smem:[#allocation3 + $0x39]]  ;;  %s480_s2 = scalar_lea.vmem [#allocation4], %s1850_s18  ;;  %v1136_v36 = vsel %vm111_vm1, %v1135_v21, %v263_v18 }
  0x4d   :  { %v459_v42 = vrot.slane %v458_v37, 4  ;;  %v481_v43 = vld [vmem:[%s480_s2] sm:$0x1]  ;;  %v502_v44 = vrot.slane %v477_v38, 6  ;;  %s484_s30 = scalar_lea.vmem [#allocation4], %s1854_s19  ;;  %s1878_s5 = sld [smem:[#allocation3 + $0x3a]] }
  0x4e   :  { %v485_v45 = vld [vmem:[%s484_s30] sm:$0x1]  ;;  %v505_v46 = vrot.slane %v481_v43, 5  ;;  %v519_v47 = vsel %vm109_vm0, %v469_v33, %v499_v39  ;;  %s488_s7 = scalar_lea.vmem [#allocation4], %s1858_s21  ;;  %s1882_s10 = sld [smem:[#allocation3 + $0x3b]]  ;;  %v396_v22 = vrot.slane %v395_v7, 1 }
  0x4f   :  { %v489_v48 = vld [vmem:[%s488_s7] sm:$0x1]  ;;  %v508_v49 = vrot.slane %v485_v45, 4  ;;  %v520_v50 = vsel %vm111_vm1, %v519_v47, %v502_v44  ;;  %s492_s12 = scalar_lea.vmem [#allocation4], %s1862_s22  ;;  %s1886_s6 = sld [smem:[#allocation3 + $0x3c]]  ;;  %v460_v56 = vadd.f32 %v459_v42, %v458_v37  ;;  %v1137_v42 = vsel %vm113_vm2, %v1136_v36, %v330_v30 }
  0x50   :  { %v493_v52 = vld [vmem:[%s492_s12] sm:$0x1]  ;;  %v511_v53 = vrot.slane %v489_v48, 3  ;;  %v521_v54 = vsel %vm113_vm2, %v520_v50, %v505_v46  ;;  %s496_s14 = scalar_lea.vmem [#allocation4], %s1865_s25  ;;  %s1891_s15 = sld [smem:[#allocation3 + $0x3d]]  ;;  %v397_v39 = vadd.f32 %v396_v22, %v395_v7 }
  0x51   :  { %v497_v57 = vld [vmem:[%s496_s14] sm:$0x1]  ;;  %v514_v58 = vrot.slane %v493_v52, 2  ;;  %v522_v59 = vsel %vm115_vm3, %v521_v54, %v508_v49  ;;  %s535_s16 = scalar_lea.vmem [#allocation4], %s1869_s28  ;;  %s1899_s8 = sld [smem:[#allocation3 + $0x3e]]  ;;  %v461_v9 = vrot.slane %v460_v56, 2 }
  0x52   :  { %v517_v60 = vrot.slane %v497_v57, 1  ;;  %v523_v61 = vsel %vm117_vm4, %v522_v59, %v511_v53  ;;  %v536_v1 = vld [vmem:[%s535_s16] sm:$0x1]  ;;  %s539_s11 = scalar_lea.vmem [#allocation4], %s1873_s1  ;;  %s1905_s17 = sld [smem:[#allocation3 + $0x3f]]  ;;  %v1138_v46 = vsel %vm115_vm3, %v1137_v42, %v397_v39 }
  0x53   :  { %v524_v0 = vsel %vm119_vm5, %v523_v61, %v514_v58  ;;  %v540_v2 = vld [vmem:[%s539_s11] sm:$0x1]  ;;  %s543_s13 = scalar_lea.vmem [#allocation4], %s1878_s5  ;;  %v462_v23 = vadd.f32 %v461_v9, %v460_v56  ;;  %s1917_s21 = sld [smem:[#allocation3 + $0x40]] }
  0x54   :  { %v525_v6 = vsel %vm121_vm6, %v524_v0, %v517_v60  ;;  %v566_v4 = vrot.slane %v540_v2, 7  ;;  %v544_v11 = vld [vmem:[%s543_s13] sm:$0x1]  ;;  %s547_s9 = scalar_lea.vmem [#allocation4], %s1882_s10  ;;  %s1920_s22 = sld [smem:[#allocation3 + $0x41]] }
  0x55   :  { %v526_v10 = vrot.slane %v525_v6, 4  ;;  %v548_v12 = vld [vmem:[%s547_s9] sm:$0x1]  ;;  %v569_v13 = vrot.slane %v544_v11, 6  ;;  %s551_s18 = scalar_lea.vmem [#allocation4], %s1886_s6  ;;  %s1924_s24 = sld [smem:[#allocation3 + $0x42]] }
  0x56   :  { %v586_v14 = vsel %vm109_vm0, %v536_v1, %v566_v4  ;;  %v552_v16 = vld [vmem:[%s551_s18] sm:$0x1]  ;;  %v572_v17 = vrot.slane %v548_v12, 5  ;;  %s555_s19 = scalar_lea.vmem [#allocation4], %s1891_s15  ;;  %v463_v37 = vrot.slane %v462_v23, 1  ;;  %s1927_s25 = sld [smem:[#allocation3 + $0x43]] }
  0x57   :  { %v527_v15 = vadd.f32 %v526_v10, %v525_v6  ;;  %v575_v19 = vrot.slane %v552_v16, 4  ;;  %v587_v20 = vsel %vm111_vm1, %v586_v14, %v569_v13  ;;  %v556_v25 = vld [vmem:[%s555_s19] sm:$0x1]  ;;  %s559_s20 = scalar_lea.vmem [#allocation4], %s1899_s8  ;;  %s1930_s0 = sld [smem:[#allocation3 + $0x44]] }
  0x58   :  { %v588_v26 = vsel %vm113_vm2, %v587_v20, %v572_v17  ;;  %v560_v27 = vld [vmem:[%s559_s20] sm:$0x1]  ;;  %v578_v28 = vrot.slane %v556_v25, 3  ;;  %s563_s23 = scalar_lea.vmem [#allocation4], %s1905_s17  ;;  %s1933_s28 = sld [smem:[#allocation3 + $0x45]]  ;;  %v464_v44 = vadd.f32 %v463_v37, %v462_v23 }
  0x59   :  { %v528_v24 = vrot.slane %v527_v15, 2  ;;  %v589_v29 = vsel %vm115_vm3, %v588_v26, %v575_v19  ;;  %v564_v31 = vld [vmem:[%s563_s23] sm:$0x1]  ;;  %v581_v32 = vrot.slane %v560_v27, 2  ;;  %s1935_s29 = sld [smem:[#allocation3 + $0x46]]  ;;  %s602_s18 = scalar_lea.vmem [#allocation4], %s1917_s21 }
  0x5a   :  { %v584_v34 = vrot.slane %v564_v31, 1  ;;  %v590_v35 = vsel %vm117_vm4, %v589_v29, %v578_v28  ;;  %s1937_s1 = sld [smem:[#allocation3 + $0x47]]  ;;  %v1139_v50 = vsel %vm117_vm4, %v1138_v46, %v464_v44  ;;  %s606_s16 = scalar_lea.vmem [#allocation4], %s1920_s22  ;;  %v603_v58 = vld [vmem:[%s602_s18] sm:$0x1] }
  0x5b   :  { %v529_v33 = vadd.f32 %v528_v24, %v527_v15  ;;  %v591_v38 = vsel %vm119_vm5, %v590_v35, %v581_v32  ;;  %s1940_s2 = sld [smem:[#allocation3 + $0x48]]  ;;  %v607_v55 = vld [vmem:[%s606_s16] sm:$0x1]  ;;  %s610_s8 = scalar_lea.vmem [#allocation4], %s1924_s24 }
  0x5c   :  { %v592_v40 = vsel %vm121_vm6, %v591_v38, %v584_v34  ;;  %s1942_s30 = sld [smem:[#allocation3 + $0x49]]  ;;  %v611_v56 = vld [vmem:[%s610_s8] sm:$0x1]  ;;  %s614_s13 = scalar_lea.vmem [#allocation4], %s1927_s25  ;;  %v633_v59 = vrot.slane %v607_v55, 7 }
  0x5d   :  { %v593_v41 = vrot.slane %v592_v40, 4  ;;  %v530_v43 = vrot.slane %v529_v33, 1  ;;  %s1944_s5 = sld [smem:[#allocation3 + $0x4a]]  ;;  %v615_v57 = vld [vmem:[%s614_s13] sm:$0x1]  ;;  %s618_s23 = scalar_lea.vmem [#allocation4], %s1930_s0 }
  0x5e   :  { %s1947_s7 = sld [smem:[#allocation3 + $0x4b]]  ;;  %v1975_v61 = vld [vmem:[%s618_s23] sm:$0x1]  ;;  %v636_v62 = vrot.slane %v611_v56, 6  ;;  %s622_s24 = scalar_lea.vmem [#allocation4], %s1933_s28  ;;  %v639_v3 = vrot.slane %v615_v57, 5  ;;  %v653_v4 = vsel %vm109_vm0, %v603_v58, %v633_v59 }
  0x5f   :  { %v594_v45 = vadd.f32 %v593_v41, %v592_v40  ;;  %v531_v48 = vadd.f32 %v530_v43, %v529_v33  ;;  %s1949_s10 = sld [smem:[#allocation3 + $0x4c]]  ;;  %v1980_v63 = vld [vmem:[%s622_s24] sm:$0x1]  ;;  %v642_v6 = vrot.slane %v1975_v61, 4 }
  0x60   :  { %s1951_s12 = sld [smem:[#allocation3 + $0x4d]]  ;;  %v645_v11 = vrot.slane %v1980_v63, 3  ;;  %v654_v14 = vsel %vm111_vm1, %v653_v4, %v636_v62 }
  0x61   :  { %v595_v47 = vrot.slane %v594_v45, 2  ;;  %v1140_v52 = vsel %vm119_vm5, %v1139_v50, %v531_v48  ;;  %s1954_s6 = sld [smem:[#allocation3 + $0x4e]]  ;;  %s669_s25 = scalar_lea.vmem [#allocation4], %s1940_s2  ;;  %v655_v22 = vsel %vm113_vm2, %v654_v14, %v639_v3 }
  0x62   :  { %s1956_s14 = sld [smem:[#allocation3 + $0x4f]]  ;;  %s673_s19 = scalar_lea.vmem [#allocation4], %s1942_s30  ;;  %v670_v0 = vld [vmem:[%s669_s25] sm:$0x1]  ;;  %v656_v33 = vsel %vm115_vm3, %v655_v22, %v642_v6 }
  0x63   :  { %v596_v49 = vadd.f32 %v595_v47, %v594_v45  ;;  %s1958_s15 = sld [smem:[#allocation3 + $0x51]]  ;;  %v674_v60 = vld [vmem:[%s673_s19] sm:$0x1]  ;;  %s677_s21 = scalar_lea.vmem [#allocation4], %s1944_s5  ;;  %v657_v44 = vsel %vm117_vm4, %v656_v33, %v645_v11 }
  0x64   :  { %s1962_s11 = sld [smem:[#allocation3 + $0x50]]  ;;  %v678_v1 = vld [vmem:[%s677_s21] sm:$0x1]  ;;  %v700_v2 = vrot.slane %v674_v60, 7  ;;  %s681_s0 = scalar_lea.vmem [#allocation4], %s1947_s7 }
  0x65   :  { %v597_v51 = vrot.slane %v596_v49, 1  ;;  %s1965_s17 = sld [smem:[#allocation3 + $0x52]]  ;;  %v682_v5 = vld [vmem:[%s681_s0] sm:$0x1]  ;;  %s685_s28 = scalar_lea.vmem [#allocation4], %s1949_s10  ;;  %v703_v9 = vrot.slane %v678_v1, 6 }
  0x66   :  { %s1968_s9 = sld [smem:[#allocation3 + $0x53]]  ;;  %v686_v7 = vld [vmem:[%s685_s28] sm:$0x1]  ;;  %s689_s7 = scalar_lea.vmem [#allocation4], %s1951_s12  ;;  %v720_v13 = vsel %vm109_vm0, %v670_v0, %v700_v2  ;;  %v706_v8 = vrot.slane %v682_v5, 5 }
  0x67   :  { %v598_v53 = vadd.f32 %v597_v51, %v596_v49  ;;  %s1972_s20 = sld [smem:[#allocation3 + $0x54]]  ;;  %v1999_v12 = vld [vmem:[%s689_s7] sm:$0x1]  ;;  %v709_v18 = vrot.slane %v686_v7, 4  ;;  %v721_v19 = vsel %vm111_vm1, %v720_v13, %v703_v9  ;;  %s630_s25 = scalar_lea.vmem [#allocation4], %s1937_s1 }
  0x68   :  { %s1977_s22 = sld [smem:[#allocation3 + $0x55]]  ;;  %v712_v23 = vrot.slane %v1999_v12, 3  ;;  %v2022_v25 = vld [vmem:[%s630_s25] sm:$0x1]  ;;  %v722_v29 = vsel %vm113_vm2, %v721_v19, %v706_v8 }
  0x69   :  { %v1141_v54 = vsel %vm121_vm6, %v1140_v52, %v598_v53  ;;  %s1984_s30 = sld [smem:[#allocation3 + $0x56]]  ;;  %s740_s5 = scalar_lea.vmem [#allocation4], %s1958_s15  ;;  %v723_v41 = vsel %vm115_vm3, %v722_v29, %v709_v18  ;;  %v651_v43 = vrot.slane %v2022_v25, 1 }
  0x6a   :  { %1185 = vmatmul.f32.vlgmr.msra.gmra.mxu0 %v1141_v54  ;;  %s1987_s16 = sld [smem:[#allocation3 + $0x58]]  ;;  %v741_v10 = vld [vmem:[%s740_s5] sm:$0x1]  ;;  %s736_s10 = scalar_lea.vmem [#allocation4], %s1962_s11  ;;  %v724_v52 = vsel %vm117_vm4, %v723_v41, %v712_v23 }
  0x6b   :  { %s1992_s2 = sld [smem:[#allocation3 + $0x59]]  ;;  %v737_v15 = vld [vmem:[%s736_s10] sm:$0x1]  ;;  %s744_s18 = scalar_lea.vmem [#allocation4], %s1965_s17  ;;  %v767_v17 = vrot.slane %v741_v10, 7 }
  0x6c   :  { %s1995_s8 = sld [smem:[#allocation3 + $0x5a]]  ;;  %v745_v16 = vld [vmem:[%s744_s18] sm:$0x1]  ;;  %s748_s19 = scalar_lea.vmem [#allocation4], %s1968_s9 }
  0x6d   :  { %s2002_s13 = sld [smem:[#allocation3 + $0x5b]]  ;;  %v749_v20 = vld [vmem:[%s748_s19] sm:$0x1]  ;;  %s626_s11 = scalar_lea.vmem [#allocation4], %s1935_s29  ;;  %v770_v26 = vrot.slane %v745_v16, 6  ;;  %v787_v30 = vsel %vm109_vm0, %v737_v15, %v767_v17 }
  0x6e   :  { %s2006_s15 = sld [smem:[#allocation3 + $0x57]]  ;;  %v627_v21 = vld [vmem:[%s626_s11] sm:$0x1]  ;;  %s693_s29 = scalar_lea.vmem [#allocation4], %s1954_s6  ;;  %v773_v37 = vrot.slane %v749_v20, 5 }
  0x6f   :  { %s2009_s12 = sld [smem:[#allocation3 + $0x5c]]  ;;  %v694_v28 = vld [vmem:[%s693_s29] sm:$0x1]  ;;  %s752_s6 = scalar_lea.vmem [#allocation4], %s1972_s20  ;;  %v648_v39 = vrot.slane %v627_v21, 2  ;;  %v788_v42 = vsel %vm111_vm1, %v787_v30, %v770_v26 }
  0x70   :  { %s2013_s23 = sld [smem:[#allocation3 + $0x5d]]  ;;  %s803_s17 = scalar_lea.vmem [#allocation4], %s1987_s16  ;;  %v753_v36 = vld [vmem:[%s752_s6] sm:$0x1]  ;;  %v715_v47 = vrot.slane %v694_v28, 2  ;;  %v789_v54 = vsel %vm113_vm2, %v788_v42, %v773_v37 }
  0x71   :  { %v804_v24 = vld [vmem:[%s803_s17] sm:$0x1]  ;;  %s2019_s24 = sld [smem:[#allocation3 + $0x5e]]  ;;  %s807_s9 = scalar_lea.vmem [#allocation4], %s1992_s2  ;;  %v776_v49 = vrot.slane %v753_v36, 4  ;;  %v658_v56 = vsel %vm119_vm5, %v657_v44, %v648_v39 }
  0x72   :  { %v808_v27 = vld [vmem:[%s807_s9] sm:$0x1]  ;;  %s2025_s21 = sld [smem:[#allocation3 + $0x5f]]  ;;  %s811_s0 = scalar_lea.vmem [#allocation4], %s1995_s8  ;;  %v725_v63 = vsel %vm119_vm5, %v724_v52, %v715_v47  ;;  %v659_v5 = vsel %vm121_vm6, %v658_v56, %v651_v43 }
  0x73   :  { %v812_v31 = vld [vmem:[%s811_s0] sm:$0x1]  ;;  %v834_v32 = vrot.slane %v808_v27, 7  ;;  %s2031_s16 = sld [smem:[#allocation3 + $0x60]]  ;;  %s815_s1 = scalar_lea.vmem [#allocation4], %s2002_s13  ;;  %v790_v1 = vsel %vm115_vm3, %v789_v54, %v776_v49  ;;  %v660_v21 = vrot.slane %v659_v5, 4 }
  0x74   :  { %v816_v34 = vld [vmem:[%s815_s1] sm:$0x1]  ;;  %v837_v35 = vrot.slane %v812_v31, 6  ;;  %s2035_s28 = sld [smem:[#allocation3 + $0x61]]  ;;  %s697_s5 = scalar_lea.vmem [#allocation4], %s1956_s14 }
  0x75   :  { %v854_v38 = vsel %vm109_vm0, %v804_v24, %v834_v32  ;;  %s2039_s2 = sld [smem:[#allocation3 + $0x62]]  ;;  %v698_v40 = vld [vmem:[%s697_s5] sm:$0x1]  ;;  %s819_s20 = scalar_lea.vmem [#allocation4], %s2009_s12  ;;  %v840_v46 = vrot.slane %v816_v34, 5  ;;  %v661_v33 = vadd.f32 %v660_v21, %v659_v5 }
  0x76   :  { %s2044_s8 = sld [smem:[#allocation3 + $0x63]]  ;;  %v820_v45 = vld [vmem:[%s819_s20] sm:$0x1]  ;;  %s756_s14 = scalar_lea.vmem [#allocation4], %s1977_s22  ;;  %v855_v50 = vsel %vm111_vm1, %v854_v38, %v837_v35  ;;  %v718_v51 = vrot.slane %v698_v40, 1 }
  0x77   :  { %s2049_s7 = sld [smem:[#allocation3 + $0x64]]  ;;  %v757_v48 = vld [vmem:[%s756_s14] sm:$0x1]  ;;  %s760_s13 = scalar_lea.vmem [#allocation4], %s1984_s30  ;;  %v843_v57 = vrot.slane %v820_v45, 4  ;;  %v856_v61 = vsel %vm113_vm2, %v855_v50, %v840_v46  ;;  %v662_v46 = vrot.slane %v661_v33, 2 }
  0x78   :  { %v761_v53 = vld [vmem:[%s760_s13] sm:$0x1]  ;;  %s823_s10 = scalar_lea.vmem [#allocation4], %s2013_s23  ;;  %s2057_s18 = sld [smem:[#allocation3 + $0x65]]  ;;  %v779_v59 = vrot.slane %v757_v48, 3  ;;  %v726_v14 = vsel %vm121_vm6, %v725_v63, %v718_v51 }
  0x79   :  { %v824_v55 = vld [vmem:[%s823_s10] sm:$0x1]  ;;  %s870_s22 = scalar_lea.vmem [#allocation4], %s2031_s16  ;;  %s2061_s12 = sld [smem:[#allocation3 + $0x66]]  ;;  %v782_v9 = vrot.slane %v761_v53, 2  ;;  %v857_v10 = vsel %vm115_vm3, %v856_v61, %v843_v57  ;;  %v727_v26 = vrot.slane %v726_v14, 4  ;;  %v663_v61 = vadd.f32 %v662_v46, %v661_v33 }
  0x7a   :  { %v871_v58 = vld [vmem:[%s870_s22] sm:$0x1]  ;;  %s827_s19 = scalar_lea.vmem [#allocation4], %s2019_s24  ;;  %s874_s30 = scalar_lea.vmem [#allocation4], %s2035_s28  ;;  %v846_v6 = vrot.slane %v824_v55, 3  ;;  %v791_v8 = vsel %vm117_vm4, %v790_v1, %v779_v59 }
  0x7b   :  { %v828_v60 = vld [vmem:[%s827_s19] sm:$0x1]  ;;  %s2066_s23 = sld [smem:[#allocation3 + $0x67]]  ;;  %s764_s11 = scalar_lea.vmem [#allocation4], %s2006_s15  ;;  %v792_v27 = vsel %vm119_vm5, %v791_v8, %v782_v9  ;;  %v728_v37 = vadd.f32 %v727_v26, %v726_v14  ;;  %v664_v14 = vrot.slane %v663_v61, 1 }
  0x7c   :  { %v875_v62 = vld [vmem:[%s874_s30] sm:$0x1]  ;;  %s878_s17 = scalar_lea.vmem [#allocation4], %s2039_s2  ;;  %s882_s24 = scalar_lea.vmem [#allocation4], %s2044_s8  ;;  %v849_v18 = vrot.slane %v828_v60, 2  ;;  %v858_v23 = vsel %vm117_vm4, %v857_v10, %v846_v6 }
  0x7d   :  { %v765_v0 = vld [vmem:[%s764_s11] sm:$0x1]  ;;  %v901_v3 = vrot.slane %v875_v62, 7  ;;  %s886_s25 = scalar_lea.vmem [#allocation4], %s2049_s7  ;;  %s2077_s15 = sld [smem:[#allocation3 + $0x68]]  ;;  %v729_v49 = vrot.slane %v728_v37, 2 }
  0x7e   :  { %v879_v2 = vld [vmem:[%s878_s17] sm:$0x1]  ;;  %s831_s9 = scalar_lea.vmem [#allocation4], %s2025_s21  ;;  %s2083_s29 = sld [smem:[#allocation3 + $0x69]]  ;;  %v785_v22 = vrot.slane %v765_v0, 1  ;;  %v859_v30 = vsel %vm119_vm5, %v858_v23, %v849_v18 }
  0x7f   :  { %v883_v4 = vld [vmem:[%s882_s24] sm:$0x1]  ;;  %v904_v7 = vrot.slane %v879_v2, 6  ;;  %v921_v13 = vsel %vm109_vm0, %v871_v58, %v901_v3  ;;  %s890_s0 = scalar_lea.vmem [#allocation4], %s2057_s18  ;;  %s2087_s16 = sld [smem:[#allocation3 + $0x6a]]  ;;  %v730_v9 = vadd.f32 %v729_v49, %v728_v37  ;;  %v665_v37 = vadd.f32 %v664_v14, %v663_v61 }
  0x80   :  { %v887_v11 = vld [vmem:[%s886_s25] sm:$0x1]  ;;  %v907_v12 = vrot.slane %v883_v4, 5  ;;  %s894_s1 = scalar_lea.vmem [#allocation4], %s2061_s12  ;;  %s2093_s21 = sld [smem:[#allocation3 + $0x6b]]  ;;  %v793_v34 = vsel %vm121_vm6, %v792_v27, %v785_v22 }
  0x81   :  { %v832_v15 = vld [vmem:[%s831_s9] sm:$0x1]  ;;  %v910_v16 = vrot.slane %v887_v11, 4  ;;  %v922_v17 = vsel %vm111_vm1, %v921_v13, %v904_v7  ;;  %s2095_s28 = sld [smem:[#allocation3 + $0x6c]]  ;;  %s898_s6 = scalar_lea.vmem [#allocation4], %s2066_s23  ;;  %v794_v43 = vrot.slane %v793_v34, 4 }
  0x82   :  { %v891_v19 = vld [vmem:[%s890_s0] sm:$0x1]  ;;  %v923_v20 = vsel %vm113_vm2, %v922_v17, %v907_v12  ;;  %v852_v29 = vrot.slane %v832_v15, 1  ;;  %s2099_s2 = sld [smem:[#allocation3 + $0x6d]]  ;;  %v731_v23 = vrot.slane %v730_v9, 1 }
  0x83   :  { %v895_v24 = vld [vmem:[%s894_s1] sm:$0x1]  ;;  %v913_v25 = vrot.slane %v891_v19, 3  ;;  %v924_v28 = vsel %vm115_vm3, %v923_v20, %v910_v16  ;;  %s937_s5 = scalar_lea.vmem [#allocation4], %s2077_s15  ;;  %s2104_s8 = sld [smem:[#allocation3 + $0x6e]]  ;;  %v795_v57 = vadd.f32 %v794_v43, %v793_v34 }
  0x84   :  { %v899_v31 = vld [vmem:[%s898_s6] sm:$0x1]  ;;  %v916_v32 = vrot.slane %v895_v24, 2  ;;  %s941_s20 = scalar_lea.vmem [#allocation4], %s2083_s29  ;;  %s2107_s7 = sld [smem:[#allocation3 + $0x6f]]  ;;  %v860_v39 = vsel %vm121_vm6, %v859_v30, %v852_v29 }
  0x85   :  { %v925_v35 = vsel %vm117_vm4, %v924_v28, %v913_v25  ;;  %v938_v36 = vld [vmem:[%s937_s5] sm:$0x1]  ;;  %v919_v40 = vrot.slane %v899_v31, 1  ;;  %s945_s14 = scalar_lea.vmem [#allocation4], %s2087_s16  ;;  %s2111_s13 = sld [smem:[#allocation3 + $0x70]]  ;;  %v861_v50 = vrot.slane %v860_v39, 4 }
  0x86   :  { %v942_v38 = vld [vmem:[%s941_s20] sm:$0x1]  ;;  %v926_v44 = vsel %vm119_vm5, %v925_v35, %v916_v32  ;;  %s2114_s10 = sld [smem:[#allocation3 + $0x71]]  ;;  %s949_s18 = scalar_lea.vmem [#allocation4], %s2093_s21  ;;  %v796_v10 = vrot.slane %v795_v57, 2 }
  0x87   :  { %v946_v41 = vld [vmem:[%s945_s14] sm:$0x1]  ;;  %v968_v42 = vrot.slane %v942_v38, 7  ;;  %s2118_s22 = sld [smem:[#allocation3 + $0x72]]  ;;  %s953_s12 = scalar_lea.vmem [#allocation4], %s2095_s28  ;;  %v927_v54 = vsel %vm121_vm6, %v926_v44, %v919_v40  ;;  %v862_v1 = vadd.f32 %v861_v50, %v860_v39  ;;  %v732_v38 = vadd.f32 %v731_v23, %v730_v9 }
  0x88   :  { %v971_v45 = vrot.slane %v946_v41, 6  ;;  %v950_v47 = vld [vmem:[%s949_s18] sm:$0x1]  ;;  %s957_s19 = scalar_lea.vmem [#allocation4], %s2099_s2  ;;  %s2124_s30 = sld [smem:[#allocation3 + $0x73]]  ;;  %v928_v2 = vrot.slane %v927_v54, 4  ;;  %v797_v24 = vadd.f32 %v796_v10, %v795_v57 }
  0x89   :  { %v988_v48 = vsel %vm109_vm0, %v938_v36, %v968_v42  ;;  %v954_v51 = vld [vmem:[%s953_s12] sm:$0x1]  ;;  %v974_v52 = vrot.slane %v950_v47, 5  ;;  %s961_s23 = scalar_lea.vmem [#allocation4], %s2104_s8  ;;  %s2128_s11 = sld [smem:[#allocation3 + $0x74]]  ;;  %v863_v16 = vrot.slane %v862_v1, 2  ;;  %v1142_v57 = vsel %vm109_vm0, %v665_v37, %v732_v38 }
  0x8a   :  { %v989_v53 = vsel %vm111_vm1, %v988_v48, %v971_v45  ;;  %v958_v55 = vld [vmem:[%s957_s19] sm:$0x1]  ;;  %v977_v56 = vrot.slane %v954_v51, 4  ;;  %s965_s17 = scalar_lea.vmem [#allocation4], %s2107_s7  ;;  %s2132_s24 = sld [smem:[#allocation3 + $0x75]]  ;;  %v929_v17 = vadd.f32 %v928_v2, %v927_v54  ;;  %v798_v39 = vrot.slane %v797_v24, 1 }
  0x8b   :  { %v962_v58 = vld [vmem:[%s961_s23] sm:$0x1]  ;;  %v980_v59 = vrot.slane %v958_v55, 3  ;;  %v990_v60 = vsel %vm113_vm2, %v989_v53, %v974_v52  ;;  %s1004_s25 = scalar_lea.vmem [#allocation4], %s2111_s13  ;;  %s2138_s9 = sld [smem:[#allocation3 + $0x76]]  ;;  %v864_v33 = vadd.f32 %v863_v16, %v862_v1 }
  0x8c   :  { %v966_v62 = vld [vmem:[%s965_s17] sm:$0x1]  ;;  %v983_v63 = vrot.slane %v962_v58, 2  ;;  %v991_v0 = vsel %vm115_vm3, %v990_v60, %v977_v56  ;;  %s1008_s15 = scalar_lea.vmem [#allocation4], %s2114_s10  ;;  %s2142_s0 = sld [smem:[#allocation3 + $0x77]]  ;;  %v930_v30 = vrot.slane %v929_v17, 2  ;;  %v799_v53 = vadd.f32 %v798_v39, %v797_v24 }
  0x8d   :  { %v986_v3 = vrot.slane %v966_v62, 1  ;;  %v992_v5 = vsel %vm117_vm4, %v991_v0, %v980_v59  ;;  %v1005_v6 = vld [vmem:[%s1004_s25] sm:$0x1]  ;;  %s1012_s29 = scalar_lea.vmem [#allocation4], %s2118_s22  ;;  %s2144_s16 = sld [smem:[#allocation3 + $0x78]]  ;;  %v865_v49 = vrot.slane %v864_v33, 1 }
  0x8e   :  { %v993_v4 = vsel %vm119_vm5, %v992_v5, %v983_v63  ;;  %v1009_v7 = vld [vmem:[%s1008_s15] sm:$0x1]  ;;  %s1016_s1 = scalar_lea.vmem [#allocation4], %s2124_s30  ;;  %s2148_s21 = sld [smem:[#allocation3 + $0x79]]  ;;  %v931_v45 = vadd.f32 %v930_v30, %v929_v17 }
  0x8f   :  { %v994_v11 = vsel %vm121_vm6, %v993_v4, %v986_v3  ;;  %v1013_v12 = vld [vmem:[%s1012_s29] sm:$0x1]  ;;  %v1035_v13 = vrot.slane %v1009_v7, 7  ;;  %s1020_s28 = scalar_lea.vmem [#allocation4], %s2128_s11  ;;  %s2152_s6 = sld [smem:[#allocation3 + $0x7a]]  ;;  %v866_v3 = vadd.f32 %v865_v49, %v864_v33 }
  0x90   :  { %v995_v8 = vrot.slane %v994_v11, 4  ;;  %v1038_v15 = vrot.slane %v1013_v12, 6  ;;  %v1017_v18 = vld [vmem:[%s1016_s1] sm:$0x1]  ;;  %s1024_s2 = scalar_lea.vmem [#allocation4], %s2132_s24  ;;  %s2155_s5 = sld [smem:[#allocation3 + $0x7b]] }
  0x91   :  { %v1055_v19 = vsel %vm109_vm0, %v1005_v6, %v1035_v13  ;;  %v1021_v20 = vld [vmem:[%s1020_s28] sm:$0x1]  ;;  %v1041_v21 = vrot.slane %v1017_v18, 5  ;;  %s2158_s8 = sld [smem:[#allocation3 + $0x7c]]  ;;  %s1028_s20 = scalar_lea.vmem [#allocation4], %s2138_s9  ;;  %v932_v63 = vrot.slane %v931_v45, 1 }
  0x92   :  { %v1056_v22 = vsel %vm111_vm1, %v1055_v19, %v1038_v15  ;;  %v1025_v25 = vld [vmem:[%s1024_s2] sm:$0x1]  ;;  %v1044_v26 = vrot.slane %v1021_v20, 4  ;;  %v996_v27 = vadd.f32 %v995_v8, %v994_v11  ;;  %s2162_s7 = sld [smem:[#allocation3 + $0x7d]]  ;;  %s1032_s14 = scalar_lea.vmem [#allocation4], %s2142_s0  ;;  %v1143_v11 = vsel %vm111_vm1, %v1142_v57, %v799_v53 }
  0x93   :  { %v1047_v28 = vrot.slane %v1025_v25, 3  ;;  %v1057_v29 = vsel %vm113_vm2, %v1056_v22, %v1041_v21  ;;  %v1029_v31 = vld [vmem:[%s1028_s20] sm:$0x1]  ;;  %s2166_s13 = sld [smem:[#allocation3 + $0x7e]]  ;;  %s1071_s18 = scalar_lea.vmem [#allocation4], %s2144_s16  ;;  %v933_v8 = vadd.f32 %v932_v63, %v931_v45  ;;  %v1144_v17 = vsel %vm113_vm2, %v1143_v11, %v866_v3 }
  0x94   :  { %v1058_v32 = vsel %vm115_vm3, %v1057_v29, %v1044_v26  ;;  %v1033_v34 = vld [vmem:[%s1032_s14] sm:$0x1]  ;;  %v1050_v35 = vrot.slane %v1029_v31, 2  ;;  %s2168_s10 = sld [smem:[#allocation3 + $0x7f]]  ;;  %v997_v41 = vrot.slane %v996_v27, 2  ;;  %s1075_s22 = scalar_lea.vmem [#allocation4], %s2148_s21 }
  0x95   :  { %v1059_v36 = vsel %vm117_vm4, %v1058_v32, %v1047_v28  ;;  %v1053_v40 = vrot.slane %v1033_v34, 1  ;;  %v1072_v43 = vld [vmem:[%s1071_s18] sm:$0x1]  ;;  %s1079_s12 = scalar_lea.vmem [#allocation4], %s2152_s6  ;;  %v1145_v21 = vsel %vm115_vm3, %v1144_v17, %v933_v8  ;;  %s1220_s0 = sshll.u32 %s2207_s4, 4  ;;  %s1221_s0 = int_to_ptr.hbm [resolvable:$true] %s1220_s0 }
  0x96   :  { %v1060_v42 = vsel %vm119_vm5, %v1059_v36, %v1050_v35  ;;  %v1076_v44 = vld [vmem:[%s1075_s22] sm:$0x1]  ;;  %s1083_s19 = scalar_lea.vmem [#allocation4], %s2155_s5  ;;  %v998_v58 = vadd.f32 %v997_v41, %v996_v27 }
  0x97   :  { %v1061_v46 = vsel %vm121_vm6, %v1060_v42, %v1053_v40  ;;  %v1080_v47 = vld [vmem:[%s1079_s12] sm:$0x1]  ;;  %v1102_v48 = vrot.slane %v1076_v44, 7  ;;  %s1087_s30 = scalar_lea.vmem [#allocation4], %s2158_s8 }
  0x98   :  { %v1062_v50 = vrot.slane %v1061_v46, 4  ;;  %v1084_v51 = vld [vmem:[%s1083_s19] sm:$0x1]  ;;  %v1105_v52 = vrot.slane %v1080_v47, 6  ;;  %s1091_s23 = scalar_lea.vmem [#allocation4], %s2162_s7  ;;  %v999_v12 = vrot.slane %v998_v58, 1 }
  0x99   :  { %v1088_v54 = vld [vmem:[%s1087_s30] sm:$0x1]  ;;  %v1108_v55 = vrot.slane %v1084_v51, 5  ;;  %v1122_v56 = vsel %vm109_vm0, %v1072_v43, %v1102_v48  ;;  %s1095_s11 = scalar_lea.vmem [#allocation4], %s2166_s13 }
  0x9a   :  { %v1063_v59 = vadd.f32 %v1062_v50, %v1061_v46  ;;  %v1092_v60 = vld [vmem:[%s1091_s23] sm:$0x1]  ;;  %v1111_v61 = vrot.slane %v1088_v54, 4  ;;  %v1123_v62 = vsel %vm111_vm1, %v1122_v56, %v1105_v52  ;;  %s1099_s17 = scalar_lea.vmem [#allocation4], %s2168_s10  ;;  %v1000_v19 = vadd.f32 %v999_v12, %v998_v58 }
  0x9b   :  { %v1096_v0 = vld [vmem:[%s1095_s11] sm:$0x1]  ;;  %v1114_v1 = vrot.slane %v1092_v60, 3  ;;  %v1124_v2 = vsel %vm113_vm2, %v1123_v62, %v1108_v55 }
  0x9c   :  { %v1064_v5 = vrot.slane %v1063_v59, 2  ;;  %v1100_v6 = vld [vmem:[%s1099_s17] sm:$0x1]  ;;  %v1117_v4 = vrot.slane %v1096_v0, 2  ;;  %v1125_v7 = vsel %vm115_vm3, %v1124_v2, %v1111_v61  ;;  %v1146_v25 = vsel %vm117_vm4, %v1145_v21, %v1000_v19 }
  0x9d   :  { %v1120_v9 = vrot.slane %v1100_v6, 1  ;;  %v1126_v10 = vsel %vm117_vm4, %v1125_v7, %v1114_v1  ;;  %v1511_v30 = vld [vmem:[%s2206_s3] ss:$0 sm:$0xff]  ;;  %s1617_s3 = smov [#allocation9]  }
  0x9e   :  { %v1065_v13 = vadd.f32 %v1064_v5, %v1063_v59  ;;  %v1127_v14 = vsel %vm119_vm5, %v1126_v10, %v1117_v4  ;;  %s1218_s15 = sshll.u32 %s1617_s3, 4  ;;  %s1219_s15 = int_to_ptr.vmem [resolvable:$true] %s1218_s15 }
  0x9f   :  { %v1128_v15 = vsel %vm121_vm6, %v1127_v14, %v1120_v9 }
  0xa0   :  { %v1129_v16 = vrot.slane %v1128_v15, 4  ;;  %v1066_v18 = vrot.slane %v1065_v13, 1 }
  0xa2   :  { %v1130_v20 = vadd.f32 %v1129_v16, %v1128_v15  ;;  %v1067_v23 = vadd.f32 %v1066_v18, %v1065_v13 }
  0xa4   :  { %v1131_v22 = vrot.slane %v1130_v20, 2  ;;  %v1147_v27 = vsel %vm119_vm5, %v1146_v25, %v1067_v23 }
  0xa6   :  { %v1132_v24 = vadd.f32 %v1131_v22, %v1130_v20 }
  0xa8   :  { %v1133_v26 = vrot.slane %v1132_v24, 1 }
  0xaa   :  { %v1134_v28 = vadd.f32 %v1133_v26, %v1132_v24 }
  0xac   :  { %v1148_v29 = vsel %vm121_vm6, %v1147_v27, %v1134_v28 }
  0xad   :  { %1188 = vmatmul.f32.vlgmr.msra.gmra.mxu1 %v1148_v29 }
  0xe7   :  { %v1186_v31 = vpop.f32.mrf.mxu0 }
  0xe8   :  { %v1187_v32 = vadd.f32 %v1511_v30, %v1186_v31 }
  0xea   :  { %1192 = vmax.xlane.f32.xlu0 %v1187_v32 }
 0x12a   :  { %v1189_v33 = vpop.f32.mrf.mxu1 }
 0x12b   :  { %v1190_v34 = vadd.f32 %v1511_v30, %v1189_v33 }
 0x12d   :  { %1194 = vmax.xlane.f32.xlu0 %v1190_v34 }
 0x15d   :  { %v1193_v35 = vpop.xlane.xlu0 %1192 }
 0x15e   :  { %v1196_v36 = vsub.f32 %v1187_v32, %v1193_v35 }
 0x160   :  { %v1198_v37 = vmul.f32 1.442695, %v1196_v36 }
 0x162   :  { %1512 = vpow2.f32 %v1198_v37 }
 0x168   :  { %v1513_v38 = vpop.eup %1512 }
 0x169   :  { %1202 = vadd.xlane.f32.xlu1 %v1513_v38 }
 0x1a0   :  { %v1195_v39 = vpop.xlane.xlu0 %1194 }
 0x1a1   :  { %v1197_v40 = vsub.f32 %v1190_v34, %v1195_v39 }
 0x1a3   :  { %v1200_v41 = vmul.f32 1.442695, %v1197_v40 }
 0x1a5   :  { %1514 = vpow2.f32 %v1200_v41 }
 0x1ab   :  { %v1515_v42 = vpop.eup %1514 }
 0x1ac   :  { %1204 = vadd.xlane.f32.xlu1 %v1515_v42 }
 0x1dc   :  { %v1203_v43 = vpop.xlane.xlu1 %1202 }
 0x1dd   :  { %1516 = vlog2.f32 %v1203_v43 }
 0x1e3   :  { %v1517_v44 = vpop.eup %1516 }
 0x1e4   :  { %v1207_v45 = vmul.f32 0.6931472, %v1517_v44 }
 0x1e6   :  { %v1210_v46 = vsub.f32 %v1196_v36, %v1207_v45 }
 0x1e8   :  { %1212 = vst [vmem:[#allocation9] sm:$0xff] %v1210_v46 }
 0x21f   :  { %v1205_v47 = vpop.xlane.xlu1 %1204 }
 0x220   :  { %1518 = vlog2.f32 %v1205_v47 }
 0x226   :  { %v1519_v48 = vpop.eup %1518 }
 0x227   :  { %v1209_v49 = vmul.f32 0.6931472, %v1519_v48 }
 0x229   :  { %v1211_v50 = vsub.f32 %v1197_v40, %v1209_v49 }
 0x22b   :  { %1213 = vst [vmem:[#allocation9 + $0x8] sm:$0xff] %v1211_v50 }
 0x22c   :  { %1226 = dma.vmem_to_hbm [thread:$0]  %s1219_s15, 256, %s1221_s0, [#allocation6], %s1614_s26, %s1614_s26, %s1615_s27  }
 0x22d   :  { %1610 = dma.done.wait [#allocation6], 256  }
 0x22e   :  { %1611 = vsyncadd [#allocation6], 4294967040 }
 0x22f   :  { %1231 = vsyncpa [#allocation5], 1 }
 0x230   :  { %1232 = vsyncpa [#allocation8], 1 }
 0x231   :  { %1233 = vsyncpa [#allocation6], 1 }

</bundles_post_ra>
